<compile_context>
chip_gen: v7x
topology: tpu7x:2x2x1
jax: 0.10.0
libtpu: 0.0.40
codegen_flags: <defaults>
</compile_context>

<pallas_src>
import jax
import jax.numpy as jnp
from jax.experimental import pallas as pl
from jax.experimental.pallas import tpu as pltpu


LANE = 128      # lane width: hidden-layer feature dims are padded to this
SUBLANE = 8     # sublane width: batch / contraction dims only need this


def _round_up(x, m):
    return ((x + m - 1) // m) * m


def dqn_kernel(x_ref,
               w1_ref, b1_ref,
               w2_ref, b2_ref,
               w3_ref, b3_ref,
               w4_ref, b4_ref,
               out_ref):
    """Fused MLP forward for one batch tile:
         relu(relu(relu(x@W1+b1)@W2+b2)@W3+b3)@W4+b4
       State arrives f32 and is cast to bf16 in-kernel; MXU gets bf16 operands,
       accumulation / bias / ReLU stay f32 (safe on v5e, free under MXU slack).
    """
    x = x_ref[...].astype(jnp.bfloat16)                                # (TB, K1)

    h = jnp.dot(x, w1_ref[...], preferred_element_type=jnp.float32) + b1_ref[...]
    h = jnp.maximum(h, 0.0).astype(jnp.bfloat16)

    h = jnp.dot(h, w2_ref[...], preferred_element_type=jnp.float32) + b2_ref[...]
    h = jnp.maximum(h, 0.0).astype(jnp.bfloat16)

    h = jnp.dot(h, w3_ref[...], preferred_element_type=jnp.float32) + b3_ref[...]
    h = jnp.maximum(h, 0.0).astype(jnp.bfloat16)

    q = jnp.dot(h, w4_ref[...], preferred_element_type=jnp.float32) + b4_ref[...]
    out_ref[...] = q.astype(out_ref.dtype)                             # (TB, A)


def dqn_forward(state, params, *, num_batch_tiles=None):
    """Run the fused DQN forward.

    state:  (B, input_dims) float array (any float dtype; cast in-kernel).
    params: kernel params from make_params() (bf16 weights, f32 biases).
    num_batch_tiles:
        None  -> auto: one grid step for small/medium batches (best on the
                 single-TensorCore v5e/v6e), tiles of <=1024 rows for huge B.
        2     -> recommended on v7x for large batches (one tile per TensorCore).
    Returns (B, n_actions) float32 Q-values.
    """
    (w1, b1), (w2, b2), (w3, b3), (w4, b4) = params
    in_p = w1.shape[0]          # sublane-aligned input dim (multiple of 8)
    n_actions = w4.shape[1]     # exact action count (output is not lane-padded)

    B, in_dims = state.shape

    if num_batch_tiles is None:
        # One step unless the batch is so large that per-tile activations
        # (~4 MiB f32 at tb=1024) are worth pipelining / must be bounded.
        tiles = max(1, pl.cdiv(_round_up(max(B, 1), SUBLANE), 1024))
    else:
        tiles = max(1, int(num_batch_tiles))

    bp = _round_up(max(B, 1), SUBLANE * tiles)
    tb = bp // tiles

    # Only pad if actually needed (no-op launch-wise for aligned inputs).
    x = state
    if (bp, in_p) != (B, in_dims):
        x = jnp.pad(x, ((0, bp - B), (0, in_p - in_dims)))

    f1p, f2p, f3p = w1.shape[1], w2.shape[1], w3.shape[1]
    itemsize = lambda a: a.size * a.dtype.itemsize
    flops = 2 * bp * (in_p * f1p + f1p * f2p + f2p * f3p + f3p * n_actions)
    bytes_accessed = (itemsize(x)
                      + itemsize(w1) + itemsize(b1) + itemsize(w2) + itemsize(b2)
                      + itemsize(w3) + itemsize(b3) + itemsize(w4) + itemsize(b4)
                      + bp * n_actions * 4)
    cost = pl.CostEstimate(flops=flops, transcendentals=0,
                           bytes_accessed=bytes_accessed)

    out = pl.pallas_call(
        dqn_kernel,
        out_shape=jax.ShapeDtypeStruct((bp, n_actions), jnp.float32),
        grid_spec=pltpu.PrefetchScalarGridSpec(
            num_scalar_prefetch=0,
            grid=(tiles,),
            in_specs=[
                # state: tiled over the batch (full feature dim as last block dim)
                pl.BlockSpec((tb, in_p), lambda i: (i, 0)),
                # weights & biases: constant block index -> VMEM-resident
                pl.BlockSpec(w1.shape, lambda i: (0, 0)),
                pl.BlockSpec(b1.shape, lambda i: (0, 0)),
                pl.BlockSpec(w2.shape, lambda i: (0, 0)),
                pl.BlockSpec(b2.shape, lambda i: (0, 0)),
                pl.BlockSpec(w3.shape, lambda i: (0, 0)),
                pl.BlockSpec(b3.shape, lambda i: (0, 0)),
                pl.BlockSpec(w4.shape, lambda i: (0, 0)),
                pl.BlockSpec(b4.shape, lambda i: (0, 0)),
            ],
            out_specs=pl.BlockSpec((tb, n_actions), lambda i: (i, 0)),
        ),
        compiler_params=pltpu.CompilerParams(
            # batch tiles are independent; lets v7x shard them across its 2 TCs
            dimension_semantics=("parallel",),
        ),
        cost_estimate=cost,
    )(x, w1, b1, w2, b2, w3, b3, w4, b4)

    if bp != B:
        out = out[:B]
    return out


def init_linear(key, in_dim, out_dim, pad_in, pad_out):
    """PyTorch nn.Linear-style init (U(-1/sqrt(in), 1/sqrt(in))), stored
    pre-transposed as (in, out).  Returns:
      * f32 master weights (unpadded) -- reference / training fidelity check
      * bf16 kernel weights zero-padded to (pad_in, pad_out), f32 bias (1, pad_out)
    """
    kw, kb = jax.random.split(key)
    bound = 1.0 / (float(in_dim) ** 0.5)
    w = jax.random.uniform(kw, (in_dim, out_dim), jnp.float32, -bound, bound)
    b = jax.random.uniform(kb, (1, out_dim), jnp.float32, -bound, bound)
    w_p = jnp.zeros((pad_in, pad_out), jnp.bfloat16).at[:in_dim, :out_dim].set(
        w.astype(jnp.bfloat16))
    b_p = jnp.zeros((1, pad_out), jnp.float32).at[:, :out_dim].set(b)
    return (w, b), (w_p, b_p)


def make_params(key, input_dims, n_actions, fc1_dims=1024, fc2_dims=512, fc3_dims=256):
    """Build (f32 master params, padded bf16 kernel params).

    Padding: the layer-1 contraction dim only needs sublane (8) alignment, the
    hidden lane dims are 128-aligned (1024/512/256 already are), and the final
    output dim is kept at exactly n_actions so the kernel's Q writeback and the
    wrapper return need no lane slice.  Padded rows/cols are zero, so the math
    is identical to the unpadded network.
    """
    k1, k2, k3, k4 = jax.random.split(key, 4)
    in_p = _round_up(input_dims, SUBLANE)     # contraction dim: sublane-aligned only
    f1_p = _round_up(fc1_dims, LANE)
    f2_p = _round_up(fc2_dims, LANE)
    f3_p = _round_up(fc3_dims, LANE)
    (m1, p1) = init_linear(k1, input_dims, fc1_dims, in_p, f1_p)
    (m2, p2) = init_linear(k2, fc1_dims, fc2_dims, f1_p, f2_p)
    (m3, p3) = init_linear(k3, fc2_dims, fc3_dims, f2_p, f3_p)
    (m4, p4) = init_linear(k4, fc3_dims, n_actions, f3_p, n_actions)
    return (m1, m2, m3, m4), (p1, p2, p3, p4)


def dqn_reference_bf16(state, params):
    """Pure-JAX reference with the kernel's exact numerics (bf16 MXU inputs,
    f32 accumulation) -- self-consistency check."""
    (w1, b1), (w2, b2), (w3, b3), (w4, b4) = params
    in_p = w1.shape[0]
    x = state.astype(jnp.bfloat16)
    if x.shape[1] != in_p:
        x = jnp.pad(x, ((0, 0), (0, in_p - x.shape[1])))
    h = jnp.maximum(jnp.dot(x, w1, preferred_element_type=jnp.float32) + b1, 0.0)
    h = jnp.maximum(jnp.dot(h.astype(jnp.bfloat16), w2,
                            preferred_element_type=jnp.float32) + b2, 0.0)
    h = jnp.maximum(jnp.dot(h.astype(jnp.bfloat16), w3,
                            preferred_element_type=jnp.float32) + b3, 0.0)
    return jnp.dot(h.astype(jnp.bfloat16), w4,
                   preferred_element_type=jnp.float32) + b4


def dqn_reference_f32(state, master_params):
    """Full-f32 reference against the unquantized master weights (fidelity to
    the PyTorch DQNNetwork numerics)."""
    (w1, b1), (w2, b2), (w3, b3), (w4, b4) = master_params
    h = jnp.maximum(state @ w1 + b1, 0.0)
    h = jnp.maximum(h @ w2 + b2, 0.0)
    h = jnp.maximum(h @ w3 + b3, 0.0)
    return h @ w4 + b4


if __name__ == "__main__":
    # Module-default hidden sizes (1024/512/256); small RL-style state/action
    # dims and a small, 8-aligned batch (no pad and no output-slice op runs).
    input_dims, n_actions = 64, 16
    fc1_dims, fc2_dims, fc3_dims = 1024, 512, 256
    B = 64

    key = jax.random.PRNGKey(0)
    k_params, k_state = jax.random.split(key)

    master_params, kernel_params = make_params(
        k_params, input_dims, n_actions, fc1_dims, fc2_dims, fc3_dims)
    state = jax.random.normal(k_state, (B, input_dims), jnp.float32)

    q_values = dqn_forward(state, kernel_params)
    jax.block_until_ready(q_values)
    assert q_values.shape == (B, n_actions)

    # Self-consistency vs. a pure-JAX path with identical bf16/f32 numerics.
    q_bf16 = dqn_reference_bf16(state, kernel_params)
    assert jnp.allclose(q_values, q_bf16, atol=2e-2, rtol=2e-2), \
        float(jnp.max(jnp.abs(q_values - q_bf16)))

    # Fidelity vs. the f32 master weights (the "true" PyTorch network).
    q_f32 = dqn_reference_f32(state, master_params)
    assert jnp.allclose(q_values, q_f32, atol=1e-1, rtol=1e-1), \
        float(jnp.max(jnp.abs(q_values - q_f32)))

    print("KERNEL_OK")
</pallas_src>

<mosaic_0001>
module attributes {stable_mosaic.version = 11 : i64} {
  func.func @dqn_kernel(%arg0: i32, %arg1: memref<64x64xf32, #tpu.memory_space<vmem>>, %arg2: memref<64x1024xbf16, #tpu.memory_space<vmem>>, %arg3: memref<1x1024xf32, #tpu.memory_space<vmem>>, %arg4: memref<1024x512xbf16, #tpu.memory_space<vmem>>, %arg5: memref<1x512xf32, #tpu.memory_space<vmem>>, %arg6: memref<512x256xbf16, #tpu.memory_space<vmem>>, %arg7: memref<1x256xf32, #tpu.memory_space<vmem>>, %arg8: memref<256x16xbf16, #tpu.memory_space<vmem>>, %arg9: memref<1x16xf32, #tpu.memory_space<vmem>>, %arg10: memref<64x16xf32, #tpu.memory_space<vmem>>) attributes {dimension_semantics = [#tpu.dimension_semantics<parallel>], iteration_bounds = array<i64: 1>, scalar_prefetch = 0 : i64, scratch_operands = 0 : i64, tpu.core_type = #tpu.core_type<tc>, window_params = [{transform_indices = @transform_0, window_bounds = array<i64: 64, 64>}, {pipeline_mode = #tpu.pipeline_mode<synchronous>, transform_indices = @transform_1, window_bounds = array<i64: 64, 1024>}, {pipeline_mode = #tpu.pipeline_mode<synchronous>, transform_indices = @transform_2, window_bounds = array<i64: 1, 1024>}, {pipeline_mode = #tpu.pipeline_mode<synchronous>, transform_indices = @transform_3, window_bounds = array<i64: 1024, 512>}, {pipeline_mode = #tpu.pipeline_mode<synchronous>, transform_indices = @transform_4, window_bounds = array<i64: 1, 512>}, {pipeline_mode = #tpu.pipeline_mode<synchronous>, transform_indices = @transform_5, window_bounds = array<i64: 512, 256>}, {pipeline_mode = #tpu.pipeline_mode<synchronous>, transform_indices = @transform_6, window_bounds = array<i64: 1, 256>}, {pipeline_mode = #tpu.pipeline_mode<synchronous>, transform_indices = @transform_7, window_bounds = array<i64: 256, 16>}, {pipeline_mode = #tpu.pipeline_mode<synchronous>, transform_indices = @transform_8, window_bounds = array<i64: 1, 16>}, {transform_indices = @transform_9, window_bounds = array<i64: 64, 16>}]} {
    %c0 = arith.constant 0 : index
    %c0_0 = arith.constant 0 : index
    %0 = vector.load %arg1[%c0, %c0_0] : memref<64x64xf32, #tpu.memory_space<vmem>>, vector<64x64xf32>
    %1 = arith.truncf %0 : vector<64x64xf32> to vector<64x64xbf16>
    %c0_1 = arith.constant 0 : index
    %c0_2 = arith.constant 0 : index
    %2 = vector.load %arg2[%c0_1, %c0_2] : memref<64x1024xbf16, #tpu.memory_space<vmem>>, vector<64x1024xbf16>
    %cst = arith.constant dense<0.000000e+00> : vector<64x1024xf32>
    %3 = tpu.matmul %1, %2, %cst {dimension_numbers = #tpu.dot_dimension_numbers<[1], [0], [0], [1], [0, 0, 1, 1], [], []>} : vector<64x64xbf16>, vector<64x1024xbf16>, vector<64x1024xf32> -> vector<64x1024xf32>
    %c0_3 = arith.constant 0 : index
    %c0_4 = arith.constant 0 : index
    %4 = vector.load %arg3[%c0_3, %c0_4] : memref<1x1024xf32, #tpu.memory_space<vmem>>, vector<1x1024xf32>
    %5 = vector.broadcast %4 : vector<1x1024xf32> to vector<64x1024xf32>
    %6 = arith.addf %3, %5 : vector<64x1024xf32>
    %cst_5 = arith.constant 0.000000e+00 : f32
    %7 = vector.broadcast %cst_5 : f32 to vector<64x1024xf32>
    %8 = arith.maximumf %6, %7 : vector<64x1024xf32>
    %9 = arith.truncf %8 : vector<64x1024xf32> to vector<64x1024xbf16>
    %c0_6 = arith.constant 0 : index
    %c0_7 = arith.constant 0 : index
    %10 = vector.load %arg4[%c0_6, %c0_7] : memref<1024x512xbf16, #tpu.memory_space<vmem>>, vector<1024x512xbf16>
    %cst_8 = arith.constant dense<0.000000e+00> : vector<64x512xf32>
    %11 = tpu.matmul %9, %10, %cst_8 {dimension_numbers = #tpu.dot_dimension_numbers<[1], [0], [0], [1], [0, 0, 1, 1], [], []>} : vector<64x1024xbf16>, vector<1024x512xbf16>, vector<64x512xf32> -> vector<64x512xf32>
    %c0_9 = arith.constant 0 : index
    %c0_10 = arith.constant 0 : index
    %12 = vector.load %arg5[%c0_9, %c0_10] : memref<1x512xf32, #tpu.memory_space<vmem>>, vector<1x512xf32>
    %13 = vector.broadcast %12 : vector<1x512xf32> to vector<64x512xf32>
    %14 = arith.addf %11, %13 : vector<64x512xf32>
    %cst_11 = arith.constant 0.000000e+00 : f32
    %15 = vector.broadcast %cst_11 : f32 to vector<64x512xf32>
    %16 = arith.maximumf %14, %15 : vector<64x512xf32>
    %17 = arith.truncf %16 : vector<64x512xf32> to vector<64x512xbf16>
    %c0_12 = arith.constant 0 : index
    %c0_13 = arith.constant 0 : index
    %18 = vector.load %arg6[%c0_12, %c0_13] : memref<512x256xbf16, #tpu.memory_space<vmem>>, vector<512x256xbf16>
    %cst_14 = arith.constant dense<0.000000e+00> : vector<64x256xf32>
    %19 = tpu.matmul %17, %18, %cst_14 {dimension_numbers = #tpu.dot_dimension_numbers<[1], [0], [0], [1], [0, 0, 1, 1], [], []>} : vector<64x512xbf16>, vector<512x256xbf16>, vector<64x256xf32> -> vector<64x256xf32>
    %c0_15 = arith.constant 0 : index
    %c0_16 = arith.constant 0 : index
    %20 = vector.load %arg7[%c0_15, %c0_16] : memref<1x256xf32, #tpu.memory_space<vmem>>, vector<1x256xf32>
    %21 = vector.broadcast %20 : vector<1x256xf32> to vector<64x256xf32>
    %22 = arith.addf %19, %21 : vector<64x256xf32>
    %cst_17 = arith.constant 0.000000e+00 : f32
    %23 = vector.broadcast %cst_17 : f32 to vector<64x256xf32>
    %24 = arith.maximumf %22, %23 : vector<64x256xf32>
    %25 = arith.truncf %24 : vector<64x256xf32> to vector<64x256xbf16>
    %c0_18 = arith.constant 0 : index
    %c0_19 = arith.constant 0 : index
    %26 = vector.load %arg8[%c0_18, %c0_19] : memref<256x16xbf16, #tpu.memory_space<vmem>>, vector<256x16xbf16>
    %cst_20 = arith.constant dense<0.000000e+00> : vector<64x16xf32>
    %27 = tpu.matmul %25, %26, %cst_20 {dimension_numbers = #tpu.dot_dimension_numbers<[1], [0], [0], [1], [0, 0, 1, 1], [], []>} : vector<64x256xbf16>, vector<256x16xbf16>, vector<64x16xf32> -> vector<64x16xf32>
    %c0_21 = arith.constant 0 : index
    %c0_22 = arith.constant 0 : index
    %28 = vector.load %arg9[%c0_21, %c0_22] : memref<1x16xf32, #tpu.memory_space<vmem>>, vector<1x16xf32>
    %29 = vector.broadcast %28 : vector<1x16xf32> to vector<64x16xf32>
    %30 = arith.addf %27, %29 : vector<64x16xf32>
    %c0_23 = arith.constant 0 : index
    %c0_24 = arith.constant 0 : index
    %31 = vector.load %arg10[%c0_23, %c0_24] : memref<64x16xf32, #tpu.memory_space<vmem>>, vector<64x16xf32>
    tpu.vector_store %arg10[%c0_23, %c0_24], %30 {strides = array<i32>} : memref<64x16xf32, #tpu.memory_space<vmem>>, vector<64x16xf32>,
    return
  }
  func.func @transform_0(%arg0: i32) -> (i32, i32) {
    %c0_i32 = arith.constant 0 : i32
    %c0_i32_0 = arith.constant 0 : i32
    return %arg0, %c0_i32 : i32, i32
  }
  func.func @transform_1(%arg0: i32) -> (i32, i32) {
    %c0_i32 = arith.constant 0 : i32
    %c0_i32_0 = arith.constant 0 : i32
    %c0_i32_1 = arith.constant 0 : i32
    return %c0_i32, %c0_i32_0 : i32, i32
  }
  func.func @transform_2(%arg0: i32) -> (i32, i32) {
    %c0_i32 = arith.constant 0 : i32
    %c0_i32_0 = arith.constant 0 : i32
    %c0_i32_1 = arith.constant 0 : i32
    return %c0_i32, %c0_i32_0 : i32, i32
  }
  func.func @transform_3(%arg0: i32) -> (i32, i32) {
    %c0_i32 = arith.constant 0 : i32
    %c0_i32_0 = arith.constant 0 : i32
    %c0_i32_1 = arith.constant 0 : i32
    return %c0_i32, %c0_i32_0 : i32, i32
  }
  func.func @transform_4(%arg0: i32) -> (i32, i32) {
    %c0_i32 = arith.constant 0 : i32
    %c0_i32_0 = arith.constant 0 : i32
    %c0_i32_1 = arith.constant 0 : i32
    return %c0_i32, %c0_i32_0 : i32, i32
  }
  func.func @transform_5(%arg0: i32) -> (i32, i32) {
    %c0_i32 = arith.constant 0 : i32
    %c0_i32_0 = arith.constant 0 : i32
    %c0_i32_1 = arith.constant 0 : i32
    return %c0_i32, %c0_i32_0 : i32, i32
  }
  func.func @transform_6(%arg0: i32) -> (i32, i32) {
    %c0_i32 = arith.constant 0 : i32
    %c0_i32_0 = arith.constant 0 : i32
    %c0_i32_1 = arith.constant 0 : i32
    return %c0_i32, %c0_i32_0 : i32, i32
  }
  func.func @transform_7(%arg0: i32) -> (i32, i32) {
    %c0_i32 = arith.constant 0 : i32
    %c0_i32_0 = arith.constant 0 : i32
    %c0_i32_1 = arith.constant 0 : i32
    return %c0_i32, %c0_i32_0 : i32, i32
  }
  func.func @transform_8(%arg0: i32) -> (i32, i32) {
    %c0_i32 = arith.constant 0 : i32
    %c0_i32_0 = arith.constant 0 : i32
    %c0_i32_1 = arith.constant 0 : i32
    return %c0_i32, %c0_i32_0 : i32, i32
  }
  func.func @transform_9(%arg0: i32) -> (i32, i32) {
    %c0_i32 = arith.constant 0 : i32
    %c0_i32_0 = arith.constant 0 : i32
    return %arg0, %c0_i32 : i32, i32
  }
}

</mosaic_0001>

<bundles_post_ra>
// kernel: tpu_custom_call.1
= control target key start
LH: loop header
LB: loop body
LE: loop exit
PB: predicated region body
PF: predicated region fallthrough
CT: control target
= control target key end

     0   :  { %14 = vsyncpa [#allocation3], 0  ;;  %s5389_s0 = inlined_call_operand.vmem [shape: f32[64,64], index: 0, kind: input, shape index: {}]   ;;  %s5390_s1 = inlined_call_operand.hbm [shape: bf16[64,1024], index: 1, kind: input, shape index: {}]   ;;  %s5391_s2 = inlined_call_operand.vmem [shape: f32[1,1024], index: 2, kind: input, shape index: {}]   ;;  %s5392_s3 = inlined_call_operand.hbm [shape: bf16[1024,512], index: 3, kind: input, shape index: {}]   ;;  %s5393_s4 = inlined_call_operand.vmem [shape: f32[1,512], index: 4, kind: input, shape index: {}]   ;;  %s5394_s5 = inlined_call_operand.hbm [shape: bf16[512,256], index: 5, kind: input, shape index: {}]   ;;  %s5395_s6 = inlined_call_operand.vmem [shape: f32[1,256], index: 6, kind: input, shape index: {}]   ;;  %s5396_s7 = inlined_call_operand.vmem [shape: bf16[256,16], index: 7, kind: input, shape index: {}]   ;;  %s5397_s8 = inlined_call_operand.vmem [shape: f32[1,16], index: 8, kind: input, shape index: {}]   ;;  %s5398_s9 = inlined_call_operand.vmem [shape: f32[64,16], index: 9, kind: output, shape index: {}]  }
   0x1   :  { %15 = vsyncpa [#allocation5], 0  ;;  %s4853_s30 = smov [#allocation4]   ;;  %s4783_s13 = scalar_lea.hbm %s5392_s3, 32768 }
   0x2   :  { %s37_s10 = sshll.u32 %s4853_s30, 4  ;;  %p4784_p0 = scmp.ne.s32.totalorder %s5392_s3, %s4783_s13  ;;  %s38_s10 = int_to_ptr.vmem [resolvable:$true] %s37_s10 }
   0x3   :  { %p4787_p1 = scmp.lt.u32.totalorder %s4783_s13, %s5392_s3 }
   0x5   :  { %p4789_p2 = pnand %p4787_p1, %p4784_p0 }
   0x7   :  { %4792 = shalt.err (!%p4789_p2)
}
   0x8   :  { %s4793_s18 = scalar_lea.vmem %s38_s10, 32768  ;;  %p4798_p4 = scmp.lt.s32.totalorder %s38_s10, %s38_s10 }
   0x9   :  { %p4794_p3 = scmp.ne.s32.totalorder %s38_s10, %s4793_s18  ;;  %p4799_p5 = scmp.lt.s32.totalorder %s4793_s18, %s4793_s18 }
   0xb   :  { %p4800_p6 = por %p4799_p5, %p4798_p4 }
   0xd   :  { %p4801_p7 = pnand %p4800_p6, %p4794_p3 }
   0xf   :  { %4804 = shalt.err (!%p4801_p7)
}
  0x10   :  { %s4854_s19 = smov 256   ;;  %s4855_s20 = smov 16  }
  0x11   :  { %43 = dma.hbm_to_vmem [thread:$0]  %s5392_s3, 32768, %s38_s10, [#allocation5], %s4854_s19, %s4854_s19, %s4855_s20  }
  0x12   :  { %s4856_s23 = smov [#allocation2]   ;;  %s4805_s27 = scalar_lea.hbm %s5390_s1, 4096 }
  0x13   :  { %s23_s24 = sshll.u32 %s4856_s23, 4  ;;  %p4806_p8 = scmp.ne.s32.totalorder %s5390_s1, %s4805_s27  ;;  %s24_s24 = int_to_ptr.vmem [resolvable:$true] %s23_s24 }
  0x14   :  { %p4809_p9 = scmp.lt.u32.totalorder %s4805_s27, %s5390_s1 }
  0x16   :  { %p4811_p10 = pnand %p4809_p9, %p4806_p8 }
  0x18   :  { %4814 = shalt.err (!%p4811_p10)
}
  0x19   :  { %s4815_s12 = scalar_lea.vmem %s24_s24, 4096  ;;  %p4820_p12 = scmp.lt.s32.totalorder %s24_s24, %s24_s24 }
  0x1a   :  { %p4816_p11 = scmp.ne.s32.totalorder %s24_s24, %s4815_s12  ;;  %p4821_p13 = scmp.lt.s32.totalorder %s4815_s12, %s4815_s12 }
  0x1c   :  { %p4822_p0 = por %p4821_p13, %p4820_p12 }
  0x1e   :  { %p4823_p1 = pnand %p4822_p0, %p4816_p11 }
  0x20   :  { %4826 = shalt.err (!%p4823_p1)
}
  0x21   :  { %s4857_s3 = smov 512   ;;  %s4858_s10 = smov 32  }
  0x22   :  { %29 = dma.hbm_to_vmem [thread:$0]  %s5390_s1, 4096, %s24_s24, [#allocation3], %s4857_s3, %s4857_s3, %s4858_s10  }
  0x23   :  { %s4859_s15 = smov [#allocation6]   ;;  %s4827_s19 = scalar_lea.hbm %s5394_s5, 8192 }
  0x24   :  { %s51_s16 = sshll.u32 %s4859_s15, 4  ;;  %p4828_p2 = scmp.ne.s32.totalorder %s5394_s5, %s4827_s19  ;;  %s52_s16 = int_to_ptr.vmem [resolvable:$true] %s51_s16 }
  0x25   :  { %p4831_p3 = scmp.lt.u32.totalorder %s4827_s19, %s5394_s5 }
  0x27   :  { %p4833_p4 = pnand %p4831_p3, %p4828_p2 }
  0x29   :  { %4836 = shalt.err (!%p4833_p4)
}
  0x2a   :  { %s4837_s25 = scalar_lea.vmem %s52_s16, 8192  ;;  %p4842_p6 = scmp.lt.s32.totalorder %s52_s16, %s52_s16 }
  0x2b   :  { %p4838_p5 = scmp.ne.s32.totalorder %s52_s16, %s4837_s25  ;;  %p4843_p7 = scmp.lt.s32.totalorder %s4837_s25, %s4837_s25 }
  0x2d   :  { %p4844_p8 = por %p4843_p7, %p4842_p6 }
  0x2f   :  { %p4845_p9 = pnand %p4844_p8, %p4838_p5 }
  0x31   :  { %4848 = shalt.err (!%p4845_p9)
}
  0x32   :  { %s4860_s1 = smov 128   ;;  %s4861_s24 = smov 8  }
  0x33   :  { %57 = dma.hbm_to_vmem [thread:$0]  %s5394_s5, 8192, %s52_s16, [#allocation5], %s4860_s1, %s4860_s1, %s4861_s24  }
  0x34   :  { %4849 = dma.done.wait [#allocation3], 4096  }
  0x35   :  { %4850 = vsyncadd [#allocation3], 4294963200 }
  0x36   :  { %4851 = dma.done.wait [#allocation5], 40960  }
  0x37   :  { %4852 = vsyncadd [#allocation5], 4294926336  ;;  %v4862_v0 = vmov 0   ;;  %v86_v1 = vld [vmem:[#allocation2] sm:$0xff]  ;;  %v88_v15 = vld [vmem:[#allocation2 + $0x10] sm:$0xff]  ;;  %vm320_vm0 = vcmask 523264  }
  0x38   :  { %365 = vmatprep.mubr.bf16.mxu1 %v4862_v0  ;;  %511 = vmatprep.mubr.bf16.mxu0 %v4862_v0  ;;  %v90_v2 = vld [vmem:[#allocation2 + $0x20] sm:$0xff]  ;;  %v92_v16 = vld [vmem:[#allocation2 + $0x30] sm:$0xff]  ;;  %v87_v19 = vld [vmem:[#allocation2 + $0x8] sm:$0xff]  ;;  %vm3677_vm1 = vcmask 130048  }
  0x39   :  { %v94_v3 = vld [vmem:[#allocation2 + $0x40] sm:$0xff]  ;;  %v3693_v4 = vcombine.high %v86_v1, %v90_v2  ;;  %v3692_v5 = vcombine.low %v86_v1, %v90_v2  ;;  %v96_v17 = vld [vmem:[#allocation2 + $0x50] sm:$0xff]  ;;  %v3697_v20 = vcombine.high %v88_v15, %v92_v16  ;;  %v3696_v21 = vcombine.low %v88_v15, %v92_v16  ;;  %v91_v23 = vld [vmem:[#allocation2 + $0x28] sm:$0xff] }
  0x3a   :  { %v98_v6 = vld [vmem:[#allocation2 + $0x60] sm:$0xff]  ;;  %v100_v22 = vld [vmem:[#allocation2 + $0x70] sm:$0xff]  ;;  %v75_v29 = vld [vmem:[%s5389_s0 + $0x8] sm:$0xff]  ;;  %v3695_v31 = vcombine.high %v87_v19, %v91_v23  ;;  %v3694_v38 = vcombine.low %v87_v19, %v91_v23 }
  0x3b   :  { %v3701_v7 = vcombine.high %v94_v3, %v98_v6  ;;  %v102_v8 = vld [vmem:[#allocation2 + $0x80] sm:$0xff]  ;;  %333 = vmatprep.subr.bf16.mxu1 %v3693_v4  ;;  %v3700_v10 = vcombine.low %v94_v3, %v98_v6  ;;  %v3705_v24 = vcombine.high %v96_v17, %v100_v22  ;;  %v104_v25 = vld [vmem:[#allocation2 + $0x90] sm:$0xff]  ;;  %479 = vmatprep.subr.bf16.mxu0 %v3697_v20  ;;  %v95_v33 = vld [vmem:[#allocation2 + $0x48] sm:$0xff] }
  0x3c   :  { %v106_v9 = vld [vmem:[#allocation2 + $0xa0] sm:$0xff]  ;;  %334 = vmatpush1.bf16.msra.mxu1 %v3692_v5  ;;  %v108_v26 = vld [vmem:[#allocation2 + $0xb0] sm:$0xff]  ;;  %480 = vmatpush1.bf16.msra.mxu0 %v3696_v21  ;;  %v3704_v30 = vcombine.low %v96_v17, %v100_v22  ;;  %v99_v34 = vld [vmem:[#allocation2 + $0x68] sm:$0xff] }
  0x3d   :  { %335 = vmatprep.subr.bf16.mxu1 %v3701_v7  ;;  %v3709_v11 = vcombine.high %v102_v8, %v106_v9  ;;  %v110_v12 = vld [vmem:[#allocation2 + $0xc0] sm:$0xff]  ;;  %v3708_v14 = vcombine.low %v102_v8, %v106_v9  ;;  %481 = vmatprep.subr.bf16.mxu0 %v3705_v24  ;;  %v3713_v32 = vcombine.high %v104_v25, %v108_v26  ;;  %v112_v36 = vld [vmem:[#allocation2 + $0xd0] sm:$0xff]  ;;  %v103_v41 = vld [vmem:[#allocation2 + $0x88] sm:$0xff] }
  0x3e   :  { %v114_v13 = vld [vmem:[#allocation2 + $0xe0] sm:$0xff]  ;;  %v116_v37 = vld [vmem:[#allocation2 + $0xf0] sm:$0xff]  ;;  %v3703_v39 = vcombine.high %v95_v33, %v99_v34  ;;  %v3712_v40 = vcombine.low %v104_v25, %v108_v26  ;;  %v107_v42 = vld [vmem:[#allocation2 + $0xa8] sm:$0xff]  ;;  %v3702_v46 = vcombine.low %v95_v33, %v99_v34 }
  0x3f   :  { %v3717_v18 = vcombine.high %v110_v12, %v114_v13  ;;  %v3716_v27 = vcombine.low %v110_v12, %v114_v13  ;;  %v74_v28 = vld [vmem:[%s5389_s0] sm:$0xff]  ;;  %v3721_v43 = vcombine.high %v112_v36, %v116_v37  ;;  %v76_v44 = vld [vmem:[%s5389_s0 + $0x10] sm:$0xff]  ;;  %v77_v45 = vld [vmem:[%s5389_s0 + $0x18] sm:$0xff]  ;;  %v3711_v47 = vcombine.high %v103_v41, %v107_v42 }
  0x40   :  { %336 = vmatpush1.bf16.msra.mxu1 %v3700_v10  ;;  %v4957_v35 = vpack.c.bf16 %v75_v29, %v74_v28  ;;  %482 = vmatpush1.bf16.msra.mxu0 %v3704_v30  ;;  %v111_v48 = vld [vmem:[#allocation2 + $0xc8] sm:$0xff]  ;;  %v3720_v49 = vcombine.low %v112_v36, %v116_v37  ;;  %v4289_v51 = vld [vmem:[#allocation4 + $0x4] ss:$16 sps:$4 sm:$0xff]   ;;  %v4968_v52 = vpack.c.bf16 %v77_v45, %v76_v44  ;;  %v89_v55 = vld [vmem:[#allocation2 + $0x18] sm:$0xff] }
  0x41   :  { %337 = vmatprep.subr.bf16.mxu1 %v3709_v11  ;;  %483 = vmatprep.subr.bf16.mxu0 %v3713_v32  ;;  %v115_v50 = vld [vmem:[#allocation2 + $0xe8] sm:$0xff]  ;;  %v3710_v53 = vcombine.low %v103_v41, %v107_v42  ;;  %v93_v56 = vld [vmem:[#allocation2 + $0x38] sm:$0xff]  ;;  %v4287_v57 = vld [vmem:[#allocation4] ss:$16 sps:$4 sm:$0xff]  }
  0x42   :  { %v3719_v54 = vcombine.high %v111_v48, %v115_v50  ;;  %v78_v58 = vld [vmem:[%s5389_s0 + $0x20] sm:$0xff]  ;;  %v79_v60 = vld [vmem:[%s5389_s0 + $0x28] sm:$0xff]  ;;  %v3718_v61 = vcombine.low %v111_v48, %v115_v50  ;;  %v3699_v62 = vcombine.high %v89_v55, %v93_v56  ;;  %v80_v4 = vld [vmem:[%s5389_s0 + $0x30] sm:$0xff]  ;;  %v3698_v16 = vcombine.low %v89_v55, %v93_v56 }
  0x43   :  { %v4295_v59 = vld [vmem:[#allocation4 + $0x24] ss:$16 sps:$4 sm:$0xff]   ;;  %v4293_v63 = vld [vmem:[#allocation4 + $0x20] ss:$16 sps:$4 sm:$0xff]   ;;  %v4982_v1 = vpack.c.bf16 %v79_v60, %v78_v58  ;;  %v81_v6 = vld [vmem:[%s5389_s0 + $0x38] sm:$0xff] }
  0x44   :  { %338 = vmatpush1.bf16.msra.mxu1 %v3708_v14  ;;  %484 = vmatpush1.bf16.msra.mxu0 %v3712_v40  ;;  %v4301_v2 = vld [vmem:[#allocation4 + $0x44] ss:$16 sps:$4 sm:$0xff]   ;;  %v4299_v3 = vld [vmem:[#allocation4 + $0x40] ss:$16 sps:$4 sm:$0xff]   ;;  %v4996_v8 = vpack.c.bf16 %v81_v6, %v80_v4  ;;  %v97_v12 = vld [vmem:[#allocation2 + $0x58] sm:$0xff] }
  0x45   :  { %339 = vmatprep.subr.bf16.mxu1 %v3717_v18  ;;  %485 = vmatprep.subr.bf16.mxu0 %v3721_v43  ;;  %v4307_v5 = vld [vmem:[#allocation4 + $0x64] ss:$16 sps:$4 sm:$0xff]   ;;  %v4305_v7 = vld [vmem:[#allocation4 + $0x60] ss:$16 sps:$4 sm:$0xff]   ;;  %v101_v13 = vld [vmem:[#allocation2 + $0x78] sm:$0xff] }
  0x46   :  { %v4313_v9 = vld [vmem:[#allocation4 + $0x84] ss:$16 sps:$4 sm:$0xff]   ;;  %v4311_v10 = vld [vmem:[#allocation4 + $0x80] ss:$16 sps:$4 sm:$0xff]   ;;  %v3707_v17 = vcombine.high %v97_v12, %v101_v13  ;;  %v105_v18 = vld [vmem:[#allocation2 + $0x98] sm:$0xff]  ;;  %v3706_v22 = vcombine.low %v97_v12, %v101_v13 }
  0x47   :  { %v4319_v11 = vld [vmem:[#allocation4 + $0xa4] ss:$16 sps:$4 sm:$0xff]   ;;  %v4317_v14 = vld [vmem:[#allocation4 + $0xa0] ss:$16 sps:$4 sm:$0xff]   ;;  %v109_v19 = vld [vmem:[#allocation2 + $0xb8] sm:$0xff] }
  0x48   :  { %340 = vmatpush1.bf16.msra.mxu1 %v3716_v27  ;;  %486 = vmatpush1.bf16.msra.mxu0 %v3720_v49  ;;  %v4325_v15 = vld [vmem:[#allocation4 + $0xc4] ss:$16 sps:$4 sm:$0xff]   ;;  %v4323_v20 = vld [vmem:[#allocation4 + $0xc0] ss:$16 sps:$4 sm:$0xff]   ;;  %v113_v23 = vld [vmem:[#allocation2 + $0xd8] sm:$0xff]  ;;  %v3715_v26 = vcombine.high %v105_v18, %v109_v19  ;;  %v3714_v28 = vcombine.low %v105_v18, %v109_v19 }
  0x49   :  { %406 = vmatprep.subr.bf16.mxu1 %v3695_v31  ;;  %2279 = vmatprep.subr.bf16.mxu0 %v4289_v51  ;;  %v4331_v21 = vld [vmem:[#allocation4 + $0xe4] ss:$16 sps:$4 sm:$0xff]   ;;  %v117_v24 = vld [vmem:[#allocation2 + $0xf8] sm:$0xff]  ;;  %v4329_v25 = vld [vmem:[#allocation4 + $0xe0] ss:$16 sps:$4 sm:$0xff]  }
  0x4a   :  { %v4337_v27 = vld [vmem:[#allocation4 + $0x104] ss:$16 sps:$4 sm:$0xff]   ;;  %v4335_v29 = vld [vmem:[#allocation4 + $0x100] ss:$16 sps:$4 sm:$0xff]   ;;  %v3723_v30 = vcombine.high %v113_v23, %v117_v24  ;;  %v4292_v32 = vld [vmem:[#allocation4 + $0xc] ss:$16 sps:$4 sm:$0xff]   ;;  %v3722_v33 = vcombine.low %v113_v23, %v117_v24 }
  0x4b   :  { %3724 = vmatmul.mubr.msk.bf16.vlgmr.msra.gmra.mrb[0].mxu1 %vm320_vm0, %v4957_v35  ;;  %3732 = vmatmul.mubr.msk.bf16.vlgmr.msra.gmra.mrb[0].mxu0 %vm320_vm0, %v4957_v35  ;;  %v4343_v31 = vld [vmem:[#allocation4 + $0x124] ss:$16 sps:$4 sm:$0xff]   ;;  %v4341_v34 = vld [vmem:[#allocation4 + $0x120] ss:$16 sps:$4 sm:$0xff]   ;;  %v4290_v44 = vld [vmem:[#allocation4 + $0x8] ss:$16 sps:$4 sm:$0xff]  }
  0x4c   :  { %407 = vmatpush1.bf16.msra.mxu1 %v3694_v38  ;;  %375 = vmatprep.mubr.bf16.mxu1 %v4862_v0  ;;  %v4349_v36 = vld [vmem:[#allocation4 + $0x144] ss:$16 sps:$4 sm:$0xff]   ;;  %v4347_v37 = vld [vmem:[#allocation4 + $0x140] ss:$16 sps:$4 sm:$0xff]   ;;  %v4298_v45 = vld [vmem:[#allocation4 + $0x2c] ss:$16 sps:$4 sm:$0xff]  }
  0x4d   :  { %408 = vmatprep.subr.bf16.mxu1 %v3703_v39  ;;  %2280 = vmatpush1.bf16.msra.mxu0 %v4287_v57  ;;  %v4355_v38 = vld [vmem:[#allocation4 + $0x164] ss:$16 sps:$4 sm:$0xff]   ;;  %v4353_v39 = vld [vmem:[#allocation4 + $0x160] ss:$16 sps:$4 sm:$0xff]   ;;  %v4302_v48 = vld [vmem:[#allocation4 + $0x48] ss:$16 sps:$4 sm:$0xff]  }
  0x4e   :  { %521 = vmatprep.mubr.bf16.mxu0 %v4862_v0  ;;  %2281 = vmatprep.subr.bf16.mxu0 %v4295_v59  ;;  %v4361_v40 = vld [vmem:[#allocation4 + $0x184] ss:$16 sps:$4 sm:$0xff]   ;;  %v4359_v41 = vld [vmem:[#allocation4 + $0x180] ss:$16 sps:$4 sm:$0xff]   ;;  %v4310_v49 = vld [vmem:[#allocation4 + $0x6c] ss:$16 sps:$4 sm:$0xff]  }
  0x4f   :  { %v4367_v42 = vld [vmem:[#allocation4 + $0x1a4] ss:$16 sps:$4 sm:$0xff]   ;;  %v4365_v43 = vld [vmem:[#allocation4 + $0x1a0] ss:$16 sps:$4 sm:$0xff]   ;;  %v4308_v50 = vld [vmem:[#allocation4 + $0x68] ss:$16 sps:$4 sm:$0xff]  }
  0x50   :  { %409 = vmatpush1.bf16.msra.mxu1 %v3702_v46  ;;  %v4296_v46 = vld [vmem:[#allocation4 + $0x28] ss:$16 sps:$4 sm:$0xff]   ;;  %v4316_v51 = vld [vmem:[#allocation4 + $0x8c] ss:$16 sps:$4 sm:$0xff]   ;;  %v4373_v57 = vld [vmem:[#allocation4 + $0x1c4] ss:$16 sps:$4 sm:$0xff]  }
  0x51   :  { %410 = vmatprep.subr.bf16.mxu1 %v3711_v47  ;;  %2282 = vmatpush1.bf16.msra.mxu0 %v4293_v63  ;;  %v4304_v47 = vld [vmem:[#allocation4 + $0x4c] ss:$16 sps:$4 sm:$0xff]   ;;  %v4326_v56 = vld [vmem:[#allocation4 + $0xc8] ss:$16 sps:$4 sm:$0xff]   ;;  %v4371_v58 = vld [vmem:[#allocation4 + $0x1c0] ss:$16 sps:$4 sm:$0xff]  }
  0x52   :  { %2283 = vmatprep.subr.bf16.mxu0 %v4301_v2  ;;  %v4328_v55 = vld [vmem:[#allocation4 + $0xcc] ss:$16 sps:$4 sm:$0xff]   ;;  %v4332_v59 = vld [vmem:[#allocation4 + $0xe8] ss:$16 sps:$4 sm:$0xff]   ;;  %v4379_v60 = vld [vmem:[#allocation4 + $0x1e4] ss:$16 sps:$4 sm:$0xff]  }
  0x53   :  { %3725 = vmatmul.mubr.msk.bf16.gmra.mrb[4].mxu1 %vm320_vm0, %v4968_v52  ;;  %3733 = vmatmul.mubr.msk.bf16.gmra.mrb[4].mxu0 %vm320_vm0, %v4968_v52  ;;  %v4338_v63 = vld [vmem:[#allocation4 + $0x108] ss:$16 sps:$4 sm:$0xff]   ;;  %v4382_v13 = vld [vmem:[#allocation4 + $0x1ec] ss:$16 sps:$4 sm:$0xff]   ;;  %v5037_v19 = vld [vmem:[%s5391_s2] sm:$0xff] }
  0x54   :  { %385 = vmatprep.mubr.bf16.mxu1 %v4862_v0  ;;  %411 = vmatpush1.bf16.msra.mxu1 %v3710_v53  ;;  %v4314_v53 = vld [vmem:[#allocation4 + $0x88] ss:$16 sps:$4 sm:$0xff]  }
  0x55   :  { %412 = vmatprep.subr.bf16.mxu1 %v3719_v54  ;;  %2284 = vmatpush1.bf16.msra.mxu0 %v4299_v3  ;;  %v4320_v54 = vld [vmem:[#allocation4 + $0xa8] ss:$16 sps:$4 sm:$0xff]   ;;  %v4352_v3 = vld [vmem:[#allocation4 + $0x14c] ss:$16 sps:$4 sm:$0xff]  }
  0x56   :  { %531 = vmatprep.mubr.bf16.mxu0 %v4862_v0  ;;  %2285 = vmatprep.subr.bf16.mxu0 %v4307_v5  ;;  %v4344_v2 = vld [vmem:[#allocation4 + $0x128] ss:$16 sps:$4 sm:$0xff]   ;;  %v4358_v5 = vld [vmem:[#allocation4 + $0x16c] ss:$16 sps:$4 sm:$0xff]  }
  0x57   :  { %v4350_v4 = vld [vmem:[#allocation4 + $0x148] ss:$16 sps:$4 sm:$0xff]  }
  0x58   :  { %413 = vmatpush1.bf16.msra.mxu1 %v3718_v61  ;;  %v4340_v61 = vld [vmem:[#allocation4 + $0x10c] ss:$16 sps:$4 sm:$0xff]   ;;  %v4356_v6 = vld [vmem:[#allocation4 + $0x168] ss:$16 sps:$4 sm:$0xff]  }
  0x59   :  { %552 = vmatprep.subr.bf16.mxu1 %v3699_v62  ;;  %2286 = vmatpush1.bf16.msra.mxu0 %v4305_v7  ;;  %v4377_v62 = vld [vmem:[#allocation4 + $0x1e0] ss:$16 sps:$4 sm:$0xff]   ;;  %v4364_v7 = vld [vmem:[#allocation4 + $0x18c] ss:$16 sps:$4 sm:$0xff]   ;;  %v4374_v12 = vld [vmem:[#allocation4 + $0x1c8] ss:$16 sps:$4 sm:$0xff]  }
  0x5a   :  { %2287 = vmatprep.subr.bf16.mxu0 %v4313_v9  ;;  %v4370_v9 = vld [vmem:[#allocation4 + $0x1ac] ss:$16 sps:$4 sm:$0xff]  }
  0x5b   :  { %3726 = vmatmul.mubr.msk.bf16.gmra.mrb[8].mxu1 %vm320_vm0, %v4982_v1  ;;  %3734 = vmatmul.mubr.msk.bf16.gmra.mrb[8].mxu0 %vm320_vm0, %v4982_v1 }
  0x5c   :  { %395 = vmatprep.mubr.bf16.mxu1 %v4862_v0  ;;  %541 = vmatprep.mubr.bf16.mxu0 %v4862_v0 }
  0x5d   :  { %2288 = vmatpush1.bf16.msra.mxu0 %v4311_v10  ;;  %v4368_v10 = vld [vmem:[#allocation4 + $0x1a8] ss:$16 sps:$4 sm:$0xff]  }
  0x5e   :  { %2289 = vmatprep.subr.bf16.mxu0 %v4319_v11  ;;  %v4376_v11 = vld [vmem:[#allocation4 + $0x1cc] ss:$16 sps:$4 sm:$0xff]  }
  0x61   :  { %2290 = vmatpush1.bf16.msra.mxu0 %v4317_v14  ;;  %v4380_v14 = vld [vmem:[#allocation4 + $0x1e8] ss:$16 sps:$4 sm:$0xff]  }
  0x62   :  { %2291 = vmatprep.subr.bf16.mxu0 %v4325_v15  ;;  %v4388_v15 = vld [vmem:[#allocation4 + $0x20c] ss:$16 sps:$4 sm:$0xff]  }
  0x63   :  { %3727 = vmatmul.mubr.msk.bf16.gmra.mrb[12].mxu1 %vm320_vm0, %v4996_v8  ;;  %3735 = vmatmul.mubr.msk.bf16.gmra.mrb[12].mxu0 %vm320_vm0, %v4996_v8 }
  0x64   :  { %438 = vmatprep.mubr.bf16.mxu1 %v4862_v0 }
  0x65   :  { %2292 = vmatpush1.bf16.msra.mxu0 %v4323_v20 }
  0x66   :  { %2293 = vmatprep.subr.bf16.mxu0 %v4331_v21 }
  0x69   :  { %2294 = vmatpush1.bf16.msra.mxu0 %v4329_v25 }
  0x6a   :  { %2295 = vmatprep.subr.bf16.mxu0 %v4337_v27 }
  0x6b   :  { %3728 = vmatmul.mubr.msk.bf16.vlgmr.msra.gmra.mrb[16].mxu1 %vm320_vm0, %v4957_v35 }
  0x6c   :  { %448 = vmatprep.mubr.bf16.mxu1 %v4862_v0  ;;  %553 = vmatpush1.bf16.msra.mxu1 %v3698_v16  ;;  %v120_v16 = vlaneseq }
  0x6d   :  { %554 = vmatprep.subr.bf16.mxu1 %v3707_v17  ;;  %2296 = vmatpush1.bf16.msra.mxu0 %v4335_v29 }
  0x6e   :  { %2297 = vmatprep.subr.bf16.mxu0 %v4343_v31  ;;  %v5029_v17 = vshrl.u32 %v120_v16, 7 }
  0x70   :  { %555 = vmatpush1.bf16.msra.mxu1 %v3706_v22  ;;  %v5032_v18 = vsub.s32 0, %v5029_v17  ;;  %v5040_v20 = vsub.s32 1, %v5029_v17 }
  0x71   :  { %556 = vmatprep.subr.bf16.mxu1 %v3715_v26  ;;  %2298 = vmatpush1.bf16.msra.mxu0 %v4341_v34 }
  0x72   :  { %2299 = vmatprep.subr.bf16.mxu0 %v4349_v36  ;;  %v5044_v21 = vrot.slane %v5037_v19, %v5032_v18  ;;  %v5048_v22 = vrot.slane %v5037_v19, %v5040_v20 }
  0x73   :  { %3729 = vmatmul.mubr.msk.bf16.gmra.mrb[20].mxu1 %vm320_vm0, %v4968_v52 }
  0x74   :  { %458 = vmatprep.mubr.bf16.mxu1 %v4862_v0  ;;  %557 = vmatpush1.bf16.msra.mxu1 %v3714_v28 }
  0x75   :  { %558 = vmatprep.subr.bf16.mxu1 %v3723_v30  ;;  %2300 = vmatpush1.bf16.msra.mxu0 %v4347_v37  ;;  %v138_v30 = vsub.s32 4, %v5029_v17 }
  0x76   :  { %2301 = vmatprep.subr.bf16.mxu0 %v4355_v38 }
  0x78   :  { %559 = vmatpush1.bf16.msra.mxu1 %v3722_v33 }
  0x79   :  { %2571 = vmatprep.subr.bf16.mxu1 %v4292_v32  ;;  %2302 = vmatpush1.bf16.msra.mxu0 %v4353_v39  ;;  %v142_v32 = vsub.s32 5, %v5029_v17  ;;  %v5057_v39 = vrot.slane %v5037_v19, %v138_v30 }
  0x7a   :  { %2303 = vmatprep.subr.bf16.mxu0 %v4361_v40 }
  0x7b   :  { %3730 = vmatmul.mubr.msk.bf16.gmra.mrb[24].mxu1 %vm320_vm0, %v4982_v1 }
  0x7c   :  { %468 = vmatprep.mubr.bf16.mxu1 %v4862_v0 }
  0x7d   :  { %2304 = vmatpush1.bf16.msra.mxu0 %v4359_v41  ;;  %v4383_v41 = vld [vmem:[#allocation4 + $0x200] ss:$16 sps:$4 sm:$0xff]  }
  0x7e   :  { %2305 = vmatprep.subr.bf16.mxu0 %v4367_v42  ;;  %v4386_v42 = vld [vmem:[#allocation4 + $0x208] ss:$16 sps:$4 sm:$0xff]  }
  0x81   :  { %2306 = vmatpush1.bf16.msra.mxu0 %v4365_v43 }
  0x82   :  { %2307 = vmatprep.subr.bf16.mxu0 %v4373_v57 }
  0x83   :  { %3731 = vmatmul.mubr.msk.bf16.gmra.mrb[28].mxu1 %vm320_vm0, %v4996_v8 }
  0x84   :  { %584 = vmatprep.mubr.bf16.mxu1 %v4862_v0 }
  0x85   :  { %2308 = vmatpush1.bf16.msra.mxu0 %v4371_v58  ;;  %v4397_v58 = vld [vmem:[#allocation4 + $0x244] ss:$16 sps:$4 sm:$0xff]  }
  0x86   :  { %2309 = vmatprep.subr.bf16.mxu0 %v4379_v60 }
  0x89   :  { %2310 = vmatpush1.bf16.msra.mxu0 %v4377_v62 }
  0x8b   :  { %3736 = vmatmul.mubr.msk.bf16.vlgmr.msra.gmra.mrb[32].mxu1 %vm320_vm0, %v4957_v35  ;;  %v4322_v35 = vld [vmem:[#allocation4 + $0xac] ss:$16 sps:$4 sm:$0xff]  }
  0x8c   :  { %2572 = vmatpush1.bf16.msra.mxu1 %v4290_v44  ;;  %594 = vmatprep.mubr.bf16.mxu1 %v4862_v0  ;;  %v5060_v44 = vrot.slane %v5037_v19, %v142_v32  ;;  %v4404_v32 = vld [vmem:[#allocation4 + $0x268] ss:$16 sps:$4 sm:$0xff]  }
  0x8d   :  { %2573 = vmatprep.subr.bf16.mxu1 %v4298_v45  ;;  %v4391_v45 = vld [vmem:[#allocation4 + $0x224] ss:$16 sps:$4 sm:$0xff]  }
  0x90   :  { %2574 = vmatpush1.bf16.msra.mxu1 %v4296_v46  ;;  %v4394_v46 = vld [vmem:[#allocation4 + $0x22c] ss:$16 sps:$4 sm:$0xff]  }
  0x91   :  { %2575 = vmatprep.subr.bf16.mxu1 %v4304_v47 }
  0x93   :  { %3737 = vmatmul.mubr.msk.bf16.gmra.mrb[36].mxu1 %vm320_vm0, %v4968_v52  ;;  %v4334_v52 = vld [vmem:[#allocation4 + $0xec] ss:$16 sps:$4 sm:$0xff]  }
  0x94   :  { %2576 = vmatpush1.bf16.msra.mxu1 %v4302_v48  ;;  %604 = vmatprep.mubr.bf16.mxu1 %v4862_v0 }
  0x95   :  { %2577 = vmatprep.subr.bf16.mxu1 %v4310_v49 }
  0x98   :  { %2578 = vmatpush1.bf16.msra.mxu1 %v4308_v50 }
  0x99   :  { %2579 = vmatprep.subr.bf16.mxu1 %v4316_v51 }
  0x9b   :  { %3738 = vmatmul.mubr.msk.bf16.gmra.mrb[40].mxu1 %vm320_vm0, %v4982_v1  ;;  %v4346_v1 = vld [vmem:[#allocation4 + $0x12c] ss:$16 sps:$4 sm:$0xff]  }
  0x9c   :  { %2580 = vmatpush1.bf16.msra.mxu1 %v4314_v53  ;;  %614 = vmatprep.mubr.bf16.mxu1 %v4862_v0  ;;  %v4385_v0 = vld [vmem:[#allocation4 + $0x204] ss:$16 sps:$4 sm:$0xff]   ;;  %v4389_v53 = vld [vmem:[#allocation4 + $0x220] ss:$16 sps:$4 sm:$0xff]  }
  0x9d   :  { %2581 = vmatprep.subr.bf16.mxu1 %v4322_v35  ;;  %2352 = vmatprep.subr.bf16.mxu0 %v4385_v0  ;;  %v4400_v0 = vld [vmem:[#allocation4 + $0x24c] ss:$16 sps:$4 sm:$0xff]  }
  0xa0   :  { %2582 = vmatpush1.bf16.msra.mxu1 %v4320_v54 }
  0xa1   :  { %2583 = vmatprep.subr.bf16.mxu1 %v4328_v55 }
  0xa3   :  { %3739 = vmatmul.mubr.msk.bf16.gmra.mrb[44].mxu1 %vm320_vm0, %v4996_v8  ;;  %v4362_v8 = vld [vmem:[#allocation4 + $0x188] ss:$16 sps:$4 sm:$0xff]  }
  0xa4   :  { %2584 = vmatpush1.bf16.msra.mxu1 %v4326_v56 }
  0xa5   :  { %2585 = vmatprep.subr.bf16.mxu1 %v4334_v52  ;;  %v4392_v52 = vld [vmem:[#allocation4 + $0x228] ss:$16 sps:$4 sm:$0xff]  }
  0xa8   :  { %2586 = vmatpush1.bf16.msra.mxu1 %v4332_v59 }
  0xa9   :  { %2587 = vmatprep.subr.bf16.mxu1 %v4340_v61 }
  0xac   :  { %2588 = vmatpush1.bf16.msra.mxu1 %v4338_v63 }
  0xad   :  { %2589 = vmatprep.subr.bf16.mxu1 %v4346_v1 }
  0xb0   :  { %2590 = vmatpush1.bf16.msra.mxu1 %v4344_v2 }
  0xb1   :  { %2591 = vmatprep.subr.bf16.mxu1 %v4352_v3 }
  0xb4   :  { %2592 = vmatpush1.bf16.msra.mxu1 %v4350_v4 }
  0xb5   :  { %2593 = vmatprep.subr.bf16.mxu1 %v4358_v5 }
  0xb8   :  { %2594 = vmatpush1.bf16.msra.mxu1 %v4356_v6 }
  0xb9   :  { %2595 = vmatprep.subr.bf16.mxu1 %v4364_v7 }
  0xbc   :  { %2596 = vmatpush1.bf16.msra.mxu1 %v4362_v8 }
  0xbd   :  { %2597 = vmatprep.subr.bf16.mxu1 %v4370_v9  ;;  %v4395_v9 = vld [vmem:[#allocation4 + $0x240] ss:$16 sps:$4 sm:$0xff]  }
  0xc0   :  { %2598 = vmatpush1.bf16.msra.mxu1 %v4368_v10  ;;  %v4398_v10 = vld [vmem:[#allocation4 + $0x248] ss:$16 sps:$4 sm:$0xff]  }
  0xc1   :  { %2599 = vmatprep.subr.bf16.mxu1 %v4376_v11 }
  0xc4   :  { %2600 = vmatpush1.bf16.msra.mxu1 %v4374_v12 }
  0xc5   :  { %2601 = vmatprep.subr.bf16.mxu1 %v4382_v13 }
  0xc8   :  { %2602 = vmatpush1.bf16.msra.mxu1 %v4380_v14  ;;  %v4403_v14 = vld [vmem:[#allocation4 + $0x264] ss:$16 sps:$4 sm:$0xff]  }
  0xc9   :  { %2644 = vmatprep.subr.bf16.mxu1 %v4388_v15  ;;  %v4406_v15 = vld [vmem:[#allocation4 + $0x26c] ss:$16 sps:$4 sm:$0xff]  }
 0x11e   :  { %v367_v23 = vpop.f32.mrb[0].mxu1  ;;  %v513_v51 = vpop.f32.mrb[0].mxu0 }
 0x11f   :  { %v368_v24 = vadd.f32 %v367_v23, %v5044_v21  ;;  %v369_v25 = vpop.f32.mrb[1].mxu1  ;;  %v514_v56 = vadd.f32 %v513_v51, %v5057_v39  ;;  %v515_v57 = vpop.f32.mrb[1].mxu0  ;;  %v130_v51 = vsub.s32 2, %v5029_v17 }
 0x120   :  { %v370_v26 = vadd.f32 %v369_v25, %v5048_v22  ;;  %v371_v27 = vpop.f32.mrb[2].mxu1  ;;  %v516_v61 = vadd.f32 %v515_v57, %v5060_v44  ;;  %v517_v62 = vpop.f32.mrb[2].mxu0 }
 0x121   :  { %v372_v28 = vadd.f32 %v371_v27, %v5044_v21  ;;  %v373_v29 = vpop.f32.mrb[3].mxu1  ;;  %v625_v33 = vmax.f32 %v368_v24, 0.0  ;;  %v629_v1 = vmax.f32 %v514_v56, 0.0  ;;  %v518_v2 = vadd.f32 %v517_v62, %v5057_v39  ;;  %v519_v3 = vpop.f32.mrb[3].mxu0  ;;  %v4424_v62 = vld [vmem:[#allocation4 + $0x2cc] ss:$16 sps:$4 sm:$0xff]  }
 0x122   :  { %v374_v31 = vadd.f32 %v373_v29, %v5048_v22  ;;  %v626_v36 = vmax.f32 %v370_v26, 0.0  ;;  %v630_v5 = vmax.f32 %v516_v61, 0.0  ;;  %v520_v6 = vadd.f32 %v519_v3, %v5060_v44  ;;  %v4421_v61 = vld [vmem:[#allocation4 + $0x2c4] ss:$16 sps:$4 sm:$0xff]   ;;  %v4422_v3 = vld [vmem:[#allocation4 + $0x2c8] ss:$16 sps:$4 sm:$0xff]  }
 0x123   :  { %v633_v34 = vmax.f32 %v372_v28, 0.0  ;;  %v637_v8 = vmax.f32 %v518_v2, 0.0 }
 0x124   :  { %v634_v37 = vmax.f32 %v374_v31, 0.0  ;;  %v638_v13 = vmax.f32 %v520_v6, 0.0  ;;  %v4401_v31 = vld [vmem:[#allocation4 + $0x260] ss:$16 sps:$4 sm:$0xff]   ;;  %v4427_v6 = vld [vmem:[#allocation4 + $0x2e4] ss:$16 sps:$4 sm:$0xff]  }
 0x125   :  { %v689_v38 = vpack.c.bf16 %v633_v34, %v625_v33  ;;  %v5071_v24 = vpack.c.bf16 %v637_v8, %v629_v1 }
 0x126   :  { %v690_v40 = vpack.c.bf16 %v634_v37, %v626_v36  ;;  %v377_v43 = vpop.f32.mrb[4].mxu1  ;;  %v5074_v27 = vpack.c.bf16 %v638_v13, %v630_v5  ;;  %v4409_v36 = vld [vmem:[#allocation4 + $0x284] ss:$16 sps:$4 sm:$0xff]   ;;  %v4412_v37 = vld [vmem:[#allocation4 + $0x28c] ss:$16 sps:$4 sm:$0xff]  }
 0x127   :  { %v378_v47 = vadd.f32 %v377_v43, %v5044_v21  ;;  %v379_v48 = vpop.f32.mrb[5].mxu1  ;;  %v4410_v43 = vld [vmem:[#allocation4 + $0x288] ss:$16 sps:$4 sm:$0xff]  }
 0x128   :  { %2311 = vmatprep.mubr.bf16.mxu0 %v690_v40  ;;  %2603 = vmatprep.mubr.bf16.mxu1 %v690_v40  ;;  %v380_v49 = vadd.f32 %v379_v48, %v5048_v22  ;;  %v381_v50 = vpop.f32.mrb[6].mxu1  ;;  %v4418_v48 = vld [vmem:[#allocation4 + $0x2ac] ss:$16 sps:$4 sm:$0xff]  }
 0x129   :  { %2312 = vmatmul.mubr.bf16.vlgmr.msra.gmra.mrb[16].mxu0 %v689_v38  ;;  %2604 = vmatmul.mubr.bf16.vlgmr.msra.gmra.mrb[48].mxu1 %v689_v38  ;;  %v641_v35 = vmax.f32 %v378_v47, 0.0  ;;  %v382_v54 = vadd.f32 %v381_v50, %v5044_v21  ;;  %v383_v55 = vpop.f32.mrb[7].mxu1  ;;  %v4415_v47 = vld [vmem:[#allocation4 + $0x2a4] ss:$16 sps:$4 sm:$0xff]  }
 0x12a   :  { %2353 = vmatpush1.bf16.msra.mxu0 %v4383_v41  ;;  %2645 = vmatpush1.bf16.msra.mxu1 %v4386_v42  ;;  %v642_v59 = vmax.f32 %v380_v49, 0.0  ;;  %v384_v60 = vadd.f32 %v383_v55, %v5048_v22  ;;  %v4407_v42 = vld [vmem:[#allocation4 + $0x280] ss:$16 sps:$4 sm:$0xff]  }
 0x12b   :  { %2354 = vmatprep.subr.bf16.mxu0 %v4391_v45  ;;  %2646 = vmatprep.subr.bf16.mxu1 %v4394_v46  ;;  %v649_v63 = vmax.f32 %v382_v54, 0.0  ;;  %v134_v54 = vsub.s32 3, %v5029_v17 }
 0x12c   :  { %v650_v4 = vmax.f32 %v384_v60, 0.0 }
 0x12d   :  { %v697_v7 = vpack.c.bf16 %v649_v63, %v641_v35  ;;  %v5087_v63 = vrot.slane %v5037_v19, %v130_v51  ;;  %v5092_v1 = vrot.slane %v5037_v19, %v134_v54 }
 0x12e   :  { %2355 = vmatpush1.bf16.msra.mxu0 %v4389_v53  ;;  %2647 = vmatpush1.bf16.msra.mxu1 %v4392_v52  ;;  %v698_v11 = vpack.c.bf16 %v650_v4, %v642_v59  ;;  %v387_v12 = vpop.f32.mrb[8].mxu1  ;;  %v4413_v52 = vld [vmem:[#allocation4 + $0x2a0] ss:$16 sps:$4 sm:$0xff]  }
 0x12f   :  { %2356 = vmatprep.subr.bf16.mxu0 %v4397_v58  ;;  %2648 = vmatprep.subr.bf16.mxu1 %v4400_v0  ;;  %v388_v16 = vadd.f32 %v387_v12, %v5044_v21  ;;  %v389_v23 = vpop.f32.mrb[9].mxu1  ;;  %v4416_v58 = vld [vmem:[#allocation4 + $0x2a8] ss:$16 sps:$4 sm:$0xff]  }
 0x130   :  { %v390_v25 = vadd.f32 %v389_v23, %v5048_v22  ;;  %v391_v26 = vpop.f32.mrb[10].mxu1  ;;  %2321 = vmatprep.mubr.bf16.mxu0 %v698_v11  ;;  %2613 = vmatprep.mubr.bf16.mxu1 %v698_v11  ;;  %v4425_v23 = vld [vmem:[#allocation4 + $0x2e0] ss:$16 sps:$4 sm:$0xff]  }
 0x131   :  { %v657_v28 = vmax.f32 %v388_v16, 0.0  ;;  %v392_v29 = vadd.f32 %v391_v26, %v5044_v21  ;;  %v393_v30 = vpop.f32.mrb[11].mxu1  ;;  %2322 = vmatmul.mubr.bf16.gmra.mrb[20].mxu0 %v697_v7  ;;  %2614 = vmatmul.mubr.bf16.gmra.mrb[52].mxu1 %v697_v7  ;;  %v4430_v7 = vld [vmem:[#allocation4 + $0x2ec] ss:$16 sps:$4 sm:$0xff]  }
 0x132   :  { %2357 = vmatpush1.bf16.msra.mxu0 %v4395_v9  ;;  %2649 = vmatpush1.bf16.msra.mxu1 %v4398_v10  ;;  %v658_v33 = vmax.f32 %v390_v25, 0.0  ;;  %v394_v34 = vadd.f32 %v393_v30, %v5048_v22  ;;  %v523_v10 = vpop.f32.mrb[4].mxu0  ;;  %v4428_v25 = vld [vmem:[#allocation4 + $0x2e8] ss:$16 sps:$4 sm:$0xff]   ;;  %v4433_v30 = vld [vmem:[#allocation4 + $0x304] ss:$16 sps:$4 sm:$0xff]  }
 0x133   :  { %2358 = vmatprep.subr.bf16.mxu0 %v4403_v14  ;;  %2650 = vmatprep.subr.bf16.mxu1 %v4406_v15  ;;  %v665_v38 = vmax.f32 %v392_v29, 0.0  ;;  %v524_v13 = vadd.f32 %v523_v10, %v5057_v39  ;;  %v525_v29 = vpop.f32.mrb[5].mxu0 }
 0x134   :  { %v666_v40 = vmax.f32 %v394_v34, 0.0  ;;  %v527_v34 = vpop.f32.mrb[6].mxu0 }
 0x135   :  { %v705_v41 = vpack.c.bf16 %v665_v38, %v657_v28  ;;  %v528_v38 = vadd.f32 %v527_v34, %v5057_v39 }
 0x136   :  { %2359 = vmatpush1.bf16.msra.mxu0 %v4401_v31  ;;  %2651 = vmatpush1.bf16.msra.mxu1 %v4404_v32  ;;  %v706_v45 = vpack.c.bf16 %v666_v40, %v658_v33  ;;  %v397_v46 = vpop.f32.mrb[12].mxu1  ;;  %v4436_v31 = vld [vmem:[#allocation4 + $0x30c] ss:$16 sps:$4 sm:$0xff]   ;;  %v526_v33 = vadd.f32 %v525_v29, %v5060_v44  ;;  %v529_v40 = vpop.f32.mrb[7].mxu0 }
 0x137   :  { %2360 = vmatprep.subr.bf16.mxu0 %v4409_v36  ;;  %2652 = vmatprep.subr.bf16.mxu1 %v4412_v37  ;;  %v398_v49 = vadd.f32 %v397_v46, %v5044_v21  ;;  %v399_v50 = vpop.f32.mrb[13].mxu1  ;;  %v645_v37 = vmax.f32 %v524_v13, 0.0  ;;  %v4434_v46 = vld [vmem:[#allocation4 + $0x308] ss:$16 sps:$4 sm:$0xff]  }
 0x138   :  { %v400_v53 = vadd.f32 %v399_v50, %v5048_v22  ;;  %v401_v35 = vpop.f32.mrb[14].mxu1  ;;  %2331 = vmatprep.mubr.bf16.mxu0 %v706_v45  ;;  %2623 = vmatprep.mubr.bf16.mxu1 %v706_v45  ;;  %v4431_v45 = vld [vmem:[#allocation4 + $0x300] ss:$16 sps:$4 sm:$0xff]   ;;  %v4439_v50 = vld [vmem:[#allocation4 + $0x324] ss:$16 sps:$4 sm:$0xff]  }
 0x139   :  { %v673_v55 = vmax.f32 %v398_v49, 0.0  ;;  %v402_v56 = vadd.f32 %v401_v35, %v5044_v21  ;;  %v403_v57 = vpop.f32.mrb[15].mxu1  ;;  %2332 = vmatmul.mubr.bf16.gmra.mrb[24].mxu0 %v705_v41  ;;  %2624 = vmatmul.mubr.bf16.gmra.mrb[56].mxu1 %v705_v41  ;;  %v653_v49 = vmax.f32 %v528_v38, 0.0 }
 0x13a   :  { %2361 = vmatpush1.bf16.msra.mxu0 %v4407_v42  ;;  %2653 = vmatpush1.bf16.msra.mxu1 %v4410_v43  ;;  %v674_v59 = vmax.f32 %v400_v53, 0.0  ;;  %v404_v60 = vadd.f32 %v403_v57, %v5048_v22  ;;  %v4419_v22 = vld [vmem:[#allocation4 + $0x2c0] ss:$16 sps:$4 sm:$0xff]   ;;  %v646_v42 = vmax.f32 %v526_v33, 0.0  ;;  %v530_v43 = vadd.f32 %v529_v40, %v5060_v44  ;;  %v4442_v53 = vld [vmem:[#allocation4 + $0x32c] ss:$16 sps:$4 sm:$0xff]  }
 0x13b   :  { %2362 = vmatprep.subr.bf16.mxu0 %v4415_v47  ;;  %2654 = vmatprep.subr.bf16.mxu1 %v4418_v48  ;;  %v681_v0 = vmax.f32 %v402_v56, 0.0 }
 0x13c   :  { %v682_v21 = vmax.f32 %v404_v60, 0.0  ;;  %v654_v56 = vmax.f32 %v530_v43, 0.0 }
 0x13d   :  { %v713_v2 = vpack.c.bf16 %v681_v0, %v673_v55 }
 0x13e   :  { %2363 = vmatpush1.bf16.msra.mxu0 %v4413_v52  ;;  %2655 = vmatpush1.bf16.msra.mxu1 %v4416_v58  ;;  %v714_v4 = vpack.c.bf16 %v682_v21, %v674_v59  ;;  %v440_v5 = vpop.f32.mrb[16].mxu1  ;;  %v5106_v58 = vpack.c.bf16 %v653_v49, %v645_v37  ;;  %v533_v59 = vpop.f32.mrb[8].mxu0  ;;  %v5109_v0 = vpack.c.bf16 %v654_v56, %v646_v42  ;;  %v4449_v49 = vld [vmem:[#allocation4 + $0x360] ss:$16 sps:$4 sm:$0xff]   ;;  %v4457_v56 = vld [vmem:[#allocation4 + $0x384] ss:$16 sps:$4 sm:$0xff]  }
 0x13f   :  { %2364 = vmatprep.subr.bf16.mxu0 %v4421_v61  ;;  %2656 = vmatprep.subr.bf16.mxu1 %v4424_v62  ;;  %v441_v8 = vadd.f32 %v440_v5, %v5087_v63  ;;  %v442_v9 = vpop.f32.mrb[17].mxu1  ;;  %v534_v21 = vadd.f32 %v533_v59, %v5057_v39  ;;  %v535_v5 = vpop.f32.mrb[9].mxu0 }
 0x140   :  { %v443_v11 = vadd.f32 %v442_v9, %v5092_v1  ;;  %2341 = vmatprep.mubr.bf16.mxu0 %v714_v4  ;;  %2633 = vmatprep.mubr.bf16.mxu1 %v714_v4  ;;  %v444_v12 = vpop.f32.mrb[18].mxu1  ;;  %v536_v9 = vadd.f32 %v535_v5, %v5060_v44  ;;  %v537_v10 = vpop.f32.mrb[10].mxu0  ;;  %v4455_v5 = vld [vmem:[#allocation4 + $0x380] ss:$16 sps:$4 sm:$0xff]  }
 0x141   :  { %v627_v14 = vmax.f32 %v441_v8, 0.0  ;;  %v445_v15 = vadd.f32 %v444_v12, %v5087_v63  ;;  %2342 = vmatmul.mubr.bf16.gmra.mrb[28].mxu0 %v713_v2  ;;  %2634 = vmatmul.mubr.bf16.gmra.mrb[60].mxu1 %v713_v2  ;;  %v446_v16 = vpop.f32.mrb[19].mxu1  ;;  %v4437_v2 = vld [vmem:[#allocation4 + $0x320] ss:$16 sps:$4 sm:$0xff]   ;;  %v661_v12 = vmax.f32 %v534_v21, 0.0  ;;  %v538_v13 = vadd.f32 %v537_v10, %v5057_v39 }
 0x142   :  { %2365 = vmatpush1.bf16.msra.mxu0 %v4419_v22  ;;  %2657 = vmatpush1.bf16.msra.mxu1 %v4422_v3  ;;  %v628_v26 = vmax.f32 %v443_v11, 0.0  ;;  %v447_v28 = vadd.f32 %v446_v16, %v5092_v1  ;;  %v4440_v22 = vld [vmem:[#allocation4 + $0x328] ss:$16 sps:$4 sm:$0xff]   ;;  %v662_v16 = vmax.f32 %v536_v9, 0.0  ;;  %v4463_v10 = vld [vmem:[#allocation4 + $0x3a4] ss:$16 sps:$4 sm:$0xff]  }
 0x143   :  { %2366 = vmatprep.subr.bf16.mxu0 %v4427_v6  ;;  %2658 = vmatprep.subr.bf16.mxu1 %v4430_v7  ;;  %v635_v32 = vmax.f32 %v445_v15, 0.0  ;;  %v4445_v6 = vld [vmem:[#allocation4 + $0x344] ss:$16 sps:$4 sm:$0xff]   ;;  %v4448_v7 = vld [vmem:[#allocation4 + $0x34c] ss:$16 sps:$4 sm:$0xff]  }
 0x144   :  { %v636_v36 = vmax.f32 %v447_v28, 0.0 }
 0x145   :  { %v5101_v41 = vpack.c.bf16 %v635_v32, %v627_v14  ;;  %v539_v14 = vpop.f32.mrb[11].mxu0  ;;  %v4454_v32 = vld [vmem:[#allocation4 + $0x36c] ss:$16 sps:$4 sm:$0xff]  }
 0x146   :  { %2367 = vmatpush1.bf16.msra.mxu0 %v4425_v23  ;;  %2659 = vmatpush1.bf16.msra.mxu1 %v4428_v25  ;;  %v692_v47 = vpack.c.bf16 %v636_v36, %v628_v26  ;;  %v450_v48 = vpop.f32.mrb[20].mxu1  ;;  %v540_v23 = vadd.f32 %v539_v14, %v5060_v44  ;;  %v4443_v25 = vld [vmem:[#allocation4 + $0x340] ss:$16 sps:$4 sm:$0xff]   ;;  %v4446_v26 = vld [vmem:[#allocation4 + $0x348] ss:$16 sps:$4 sm:$0xff]   ;;  %v543_v42 = vpop.f32.mrb[12].mxu0 }
 0x147   :  { %2368 = vmatprep.subr.bf16.mxu0 %v4433_v30  ;;  %2660 = vmatprep.subr.bf16.mxu1 %v4436_v31  ;;  %v451_v35 = vadd.f32 %v450_v48, %v5087_v63  ;;  %v452_v55 = vpop.f32.mrb[21].mxu1  ;;  %v669_v30 = vmax.f32 %v538_v13, 0.0  ;;  %v4451_v31 = vld [vmem:[#allocation4 + $0x364] ss:$16 sps:$4 sm:$0xff]   ;;  %v544_v48 = vadd.f32 %v543_v42, %v5057_v39 }
 0x148   :  { %2384 = vmatprep.mubr.bf16.mxu0 %v692_v47  ;;  %2676 = vmatprep.mubr.bf16.mxu1 %v692_v47  ;;  %v453_v57 = vadd.f32 %v452_v55, %v5092_v1  ;;  %v454_v52 = vpop.f32.mrb[22].mxu1  ;;  %v670_v36 = vmax.f32 %v540_v23, 0.0  ;;  %v545_v55 = vpop.f32.mrb[13].mxu0  ;;  %v4461_v23 = vld [vmem:[#allocation4 + $0x3a0] ss:$16 sps:$4 sm:$0xff]  }
 0x149   :  { %v643_v60 = vmax.f32 %v451_v35, 0.0  ;;  %v455_v61 = vadd.f32 %v454_v52, %v5087_v63  ;;  %v456_v62 = vpop.f32.mrb[23].mxu1  ;;  %v5122_v40 = vpack.c.bf16 %v669_v30, %v661_v12  ;;  %v546_v59 = vadd.f32 %v545_v55, %v5060_v44 }
 0x14a   :  { %2369 = vmatpush1.bf16.msra.mxu0 %v4431_v45  ;;  %2661 = vmatpush1.bf16.msra.mxu1 %v4434_v46  ;;  %v644_v3 = vmax.f32 %v453_v57, 0.0  ;;  %v457_v4 = vadd.f32 %v456_v62, %v5092_v1  ;;  %v5125_v47 = vpack.c.bf16 %v670_v36, %v662_v16  ;;  %v4460_v57 = vld [vmem:[#allocation4 + $0x38c] ss:$16 sps:$4 sm:$0xff]   ;;  %v677_v62 = vmax.f32 %v544_v48, 0.0  ;;  %v4470_v48 = vld [vmem:[#allocation4 + $0x3c8] ss:$16 sps:$4 sm:$0xff]  }
 0x14b   :  { %2370 = vmatprep.subr.bf16.mxu0 %v4439_v50  ;;  %2662 = vmatprep.subr.bf16.mxu1 %v4442_v53  ;;  %v651_v8 = vmax.f32 %v455_v61, 0.0  ;;  %v4452_v50 = vld [vmem:[#allocation4 + $0x368] ss:$16 sps:$4 sm:$0xff]   ;;  %v150_v36 = vsub.s32 7, %v5029_v17 }
 0x14c   :  { %v652_v11 = vmax.f32 %v457_v4, 0.0 }
 0x14d   :  { %v5115_v15 = vpack.c.bf16 %v651_v8, %v643_v60  ;;  %v547_v60 = vpop.f32.mrb[14].mxu0 }
 0x14e   :  { %2371 = vmatpush1.bf16.msra.mxu0 %v4437_v2  ;;  %2663 = vmatpush1.bf16.msra.mxu1 %v4440_v22  ;;  %v5118_v28 = vpack.c.bf16 %v652_v11, %v644_v3  ;;  %v460_v29 = vpop.f32.mrb[24].mxu1  ;;  %v548_v21 = vadd.f32 %v547_v60, %v5057_v39  ;;  %v549_v2 = vpop.f32.mrb[15].mxu0  ;;  %v678_v3 = vmax.f32 %v546_v59, 0.0  ;;  %v4466_v11 = vld [vmem:[#allocation4 + $0x3ac] ss:$16 sps:$4 sm:$0xff]  }
 0x14f   :  { %2372 = vmatprep.subr.bf16.mxu0 %v4445_v6  ;;  %2664 = vmatprep.subr.bf16.mxu1 %v4448_v7  ;;  %v461_v33 = vadd.f32 %v460_v29, %v5087_v63  ;;  %v462_v34 = vpop.f32.mrb[25].mxu1  ;;  %v550_v4 = vadd.f32 %v549_v2, %v5060_v44  ;;  %v4458_v6 = vld [vmem:[#allocation4 + $0x388] ss:$16 sps:$4 sm:$0xff]  }
 0x150   :  { %v463_v37 = vadd.f32 %v462_v34, %v5092_v1  ;;  %v464_v38 = vpop.f32.mrb[26].mxu1  ;;  %v685_v9 = vmax.f32 %v548_v21, 0.0  ;;  %v146_v34 = vsub.s32 6, %v5029_v17 }
 0x151   :  { %v659_v43 = vmax.f32 %v461_v33, 0.0  ;;  %v465_v45 = vadd.f32 %v464_v38, %v5087_v63  ;;  %v466_v46 = vpop.f32.mrb[27].mxu1  ;;  %v686_v13 = vmax.f32 %v550_v4, 0.0  ;;  %v4472_v38 = vld [vmem:[#allocation4 + $0x3cc] ss:$16 sps:$4 sm:$0xff]  }
 0x152   :  { %2373 = vmatpush1.bf16.msra.mxu0 %v4443_v25  ;;  %2665 = vmatpush1.bf16.msra.mxu1 %v4446_v26  ;;  %v660_v53 = vmax.f32 %v463_v37, 0.0  ;;  %v467_v35 = vadd.f32 %v466_v46, %v5092_v1  ;;  %v5138_v44 = vpack.c.bf16 %v685_v9, %v677_v62  ;;  %v4469_v37 = vld [vmem:[#allocation4 + $0x3c4] ss:$16 sps:$4 sm:$0xff]   ;;  %v4476_v62 = vld [vmem:[#allocation4 + $0x3e8] ss:$16 sps:$4 sm:$0xff]  }
 0x153   :  { %2374 = vmatprep.subr.bf16.mxu0 %v4451_v31  ;;  %2666 = vmatprep.subr.bf16.mxu1 %v4454_v32  ;;  %v667_v52 = vmax.f32 %v465_v45, 0.0  ;;  %v5141_v30 = vpack.c.bf16 %v686_v13, %v678_v3  ;;  %v4464_v31 = vld [vmem:[#allocation4 + $0x3a8] ss:$16 sps:$4 sm:$0xff]   ;;  %v5150_v45 = vrot.slane %v5037_v19, %v150_v36  ;;  %v4481_v3 = vld [vmem:[#allocation4 + $0x404] ss:$16 sps:$4 sm:$0xff]  }
 0x154   :  { %v668_v61 = vmax.f32 %v467_v35, 0.0  ;;  %v4478_v35 = vld [vmem:[#allocation4 + $0x3ec] ss:$16 sps:$4 sm:$0xff]   ;;  %v4479_v9 = vld [vmem:[#allocation4 + $0x400] ss:$16 sps:$4 sm:$0xff]  }
 0x155   :  { %v5131_v22 = vpack.c.bf16 %v667_v52, %v659_v43  ;;  %v4484_v4 = vld [vmem:[#allocation4 + $0x40c] ss:$16 sps:$4 sm:$0xff]  }
 0x156   :  { %2375 = vmatpush1.bf16.msra.mxu0 %v4449_v49  ;;  %2667 = vmatpush1.bf16.msra.mxu1 %v4452_v50  ;;  %v5134_v7 = vpack.c.bf16 %v668_v61, %v660_v53  ;;  %v470_v8 = vpop.f32.mrb[28].mxu1  ;;  %v4475_v53 = vld [vmem:[#allocation4 + $0x3e4] ss:$16 sps:$4 sm:$0xff]   ;;  %v4473_v61 = vld [vmem:[#allocation4 + $0x3e0] ss:$16 sps:$4 sm:$0xff]  }
 0x157   :  { %2376 = vmatprep.subr.bf16.mxu0 %v4457_v56  ;;  %2668 = vmatprep.subr.bf16.mxu1 %v4460_v57  ;;  %v471_v39 = vadd.f32 %v470_v8, %v5087_v63  ;;  %v472_v12 = vpop.f32.mrb[29].mxu1  ;;  %v4490_v13 = vld [vmem:[#allocation4 + $0x42c] ss:$16 sps:$4 sm:$0xff]  }
 0x158   :  { %v473_v14 = vadd.f32 %v472_v12, %v5092_v1  ;;  %v474_v16 = vpop.f32.mrb[30].mxu1  ;;  %v4487_v12 = vld [vmem:[#allocation4 + $0x424] ss:$16 sps:$4 sm:$0xff]  }
 0x159   :  { %v675_v25 = vmax.f32 %v471_v39, 0.0  ;;  %v475_v26 = vadd.f32 %v474_v16, %v5087_v63  ;;  %v476_v29 = vpop.f32.mrb[31].mxu1  ;;  %v5147_v63 = vrot.slane %v5037_v19, %v146_v34 }
 0x15a   :  { %2377 = vmatpush1.bf16.msra.mxu0 %v4455_v5  ;;  %2669 = vmatpush1.bf16.msra.mxu1 %v4458_v6  ;;  %v676_v32 = vmax.f32 %v473_v14, 0.0  ;;  %v477_v33 = vadd.f32 %v476_v29, %v5092_v1  ;;  %v4467_v1 = vld [vmem:[#allocation4 + $0x3c0] ss:$16 sps:$4 sm:$0xff]  }
 0x15b   :  { %2378 = vmatprep.subr.bf16.mxu0 %v4463_v10  ;;  %2670 = vmatprep.subr.bf16.mxu1 %v4466_v11  ;;  %v683_v42 = vmax.f32 %v475_v26, 0.0  ;;  %v4482_v10 = vld [vmem:[#allocation4 + $0x408] ss:$16 sps:$4 sm:$0xff]  }
 0x15c   :  { %v684_v43 = vmax.f32 %v477_v33, 0.0  ;;  %v4488_v33 = vld [vmem:[#allocation4 + $0x428] ss:$16 sps:$4 sm:$0xff]  }
 0x15d   :  { %v5152_v46 = vpack.c.bf16 %v683_v42, %v675_v25 }
 0x15e   :  { %2379 = vmatpush1.bf16.msra.mxu0 %v4461_v23  ;;  %2671 = vmatpush1.bf16.msra.mxu1 %v4464_v31  ;;  %v5154_v49 = vpack.c.bf16 %v684_v43, %v676_v32  ;;  %v586_v50 = vpop.f32.mrb[32].mxu1  ;;  %v4485_v32 = vld [vmem:[#allocation4 + $0x420] ss:$16 sps:$4 sm:$0xff]  }
 0x15f   :  { %2380 = vmatprep.subr.bf16.mxu0 %v4469_v37  ;;  %2672 = vmatprep.subr.bf16.mxu1 %v4472_v38  ;;  %v587_v55 = vadd.f32 %v586_v50, %v5147_v63  ;;  %v588_v56 = vpop.f32.mrb[33].mxu1  ;;  %v4493_v37 = vld [vmem:[#allocation4 + $0x444] ss:$16 sps:$4 sm:$0xff]   ;;  %v4496_v38 = vld [vmem:[#allocation4 + $0x44c] ss:$16 sps:$4 sm:$0xff]  }
 0x160   :  { %v589_v57 = vadd.f32 %v588_v56, %v5150_v45  ;;  %v590_v19 = vpop.f32.mrb[34].mxu1 }
 0x161   :  { %v631_v52 = vmax.f32 %v587_v55, 0.0  ;;  %v591_v59 = vadd.f32 %v590_v19, %v5147_v63  ;;  %v592_v60 = vpop.f32.mrb[35].mxu1  ;;  %v4502_v55 = vld [vmem:[#allocation4 + $0x46c] ss:$16 sps:$4 sm:$0xff]  }
 0x162   :  { %2381 = vmatpush1.bf16.msra.mxu0 %v4467_v1  ;;  %2673 = vmatpush1.bf16.msra.mxu1 %v4470_v48  ;;  %v632_v21 = vmax.f32 %v589_v57, 0.0  ;;  %v593_v2 = vadd.f32 %v592_v60, %v5150_v45  ;;  %v4491_v1 = vld [vmem:[#allocation4 + $0x440] ss:$16 sps:$4 sm:$0xff]   ;;  %v4494_v48 = vld [vmem:[#allocation4 + $0x448] ss:$16 sps:$4 sm:$0xff]  }
 0x163   :  { %2382 = vmatprep.subr.bf16.mxu0 %v4475_v53  ;;  %2674 = vmatprep.subr.bf16.mxu1 %v4478_v35  ;;  %v639_v5 = vmax.f32 %v591_v59, 0.0  ;;  %v4499_v35 = vld [vmem:[#allocation4 + $0x464] ss:$16 sps:$4 sm:$0xff]  }
 0x164   :  { %v640_v6 = vmax.f32 %v593_v2, 0.0 }
 0x165   :  { %v5160_v8 = vpack.c.bf16 %v639_v5, %v631_v52 }
 0x166   :  { %2383 = vmatpush1.bf16.msra.mxu0 %v4473_v61  ;;  %2675 = vmatpush1.bf16.msra.mxu1 %v4476_v62  ;;  %v5162_v11 = vpack.c.bf16 %v640_v6, %v632_v21  ;;  %v596_v39 = vpop.f32.mrb[36].mxu1  ;;  %v4497_v61 = vld [vmem:[#allocation4 + $0x460] ss:$16 sps:$4 sm:$0xff]   ;;  %v4500_v62 = vld [vmem:[#allocation4 + $0x468] ss:$16 sps:$4 sm:$0xff]  }
 0x167   :  { %2425 = vmatprep.subr.bf16.mxu0 %v4481_v3  ;;  %2717 = vmatprep.subr.bf16.mxu1 %v4484_v4  ;;  %v597_v14 = vadd.f32 %v596_v39, %v5147_v63  ;;  %v598_v16 = vpop.f32.mrb[37].mxu1  ;;  %v4505_v3 = vld [vmem:[#allocation4 + $0x484] ss:$16 sps:$4 sm:$0xff]   ;;  %v4508_v4 = vld [vmem:[#allocation4 + $0x48c] ss:$16 sps:$4 sm:$0xff]  }
 0x168   :  { %v599_v23 = vadd.f32 %v598_v16, %v5150_v45  ;;  %v600_v25 = vpop.f32.mrb[38].mxu1 }
 0x169   :  { %2385 = vmatmul.mubr.bf16.vlgmr.msra.gmra.mrb[16].mxu0 %v5101_v41  ;;  %2677 = vmatmul.mubr.bf16.vlgmr.msra.gmra.mrb[48].mxu1 %v5101_v41  ;;  %v647_v26 = vmax.f32 %v597_v14, 0.0  ;;  %v601_v29 = vadd.f32 %v600_v25, %v5147_v63  ;;  %v602_v31 = vpop.f32.mrb[39].mxu1  ;;  %v4514_v14 = vld [vmem:[#allocation4 + $0x4ac] ss:$16 sps:$4 sm:$0xff]  }
 0x16a   :  { %2426 = vmatpush1.bf16.msra.mxu0 %v4479_v9  ;;  %2718 = vmatpush1.bf16.msra.mxu1 %v4482_v10  ;;  %v648_v34 = vmax.f32 %v599_v23, 0.0  ;;  %v603_v36 = vadd.f32 %v602_v31, %v5150_v45  ;;  %v4503_v9 = vld [vmem:[#allocation4 + $0x480] ss:$16 sps:$4 sm:$0xff]   ;;  %v4506_v10 = vld [vmem:[#allocation4 + $0x488] ss:$16 sps:$4 sm:$0xff]  }
 0x16b   :  { %2427 = vmatprep.subr.bf16.mxu0 %v4487_v12  ;;  %2719 = vmatprep.subr.bf16.mxu1 %v4490_v13  ;;  %v655_v42 = vmax.f32 %v601_v29, 0.0  ;;  %v4511_v13 = vld [vmem:[#allocation4 + $0x4a4] ss:$16 sps:$4 sm:$0xff]  }
 0x16c   :  { %2394 = vmatprep.mubr.bf16.mxu0 %v5118_v28  ;;  %2686 = vmatprep.mubr.bf16.mxu1 %v5118_v28  ;;  %v656_v41 = vmax.f32 %v603_v36, 0.0 }
 0x16d   :  { %v5172_v43 = vpack.c.bf16 %v655_v42, %v647_v26 }
 0x16e   :  { %2428 = vmatpush1.bf16.msra.mxu0 %v4485_v32  ;;  %2720 = vmatpush1.bf16.msra.mxu1 %v4488_v33  ;;  %v5174_v50 = vpack.c.bf16 %v656_v41, %v648_v34  ;;  %v606_v53 = vpop.f32.mrb[40].mxu1  ;;  %v4509_v32 = vld [vmem:[#allocation4 + $0x4a0] ss:$16 sps:$4 sm:$0xff]   ;;  %v4512_v33 = vld [vmem:[#allocation4 + $0x4a8] ss:$16 sps:$4 sm:$0xff]  }
 0x16f   :  { %2429 = vmatprep.subr.bf16.mxu0 %v4493_v37  ;;  %2721 = vmatprep.subr.bf16.mxu1 %v4496_v38  ;;  %v607_v56 = vadd.f32 %v606_v53, %v5147_v63  ;;  %v608_v57 = vpop.f32.mrb[41].mxu1  ;;  %v4517_v37 = vld [vmem:[#allocation4 + $0x4c4] ss:$16 sps:$4 sm:$0xff]   ;;  %v4520_v38 = vld [vmem:[#allocation4 + $0x4cc] ss:$16 sps:$4 sm:$0xff]  }
 0x170   :  { %v609_v19 = vadd.f32 %v608_v57, %v5150_v45  ;;  %v610_v28 = vpop.f32.mrb[42].mxu1  ;;  %v4526_v53 = vld [vmem:[#allocation4 + $0x4ec] ss:$16 sps:$4 sm:$0xff]   ;;  %v4527_v57 = vld [vmem:[#allocation4 + $0x500] ss:$16 sps:$4 sm:$0xff]  }
 0x171   :  { %2395 = vmatmul.mubr.bf16.gmra.mrb[20].mxu0 %v5115_v15  ;;  %2687 = vmatmul.mubr.bf16.gmra.mrb[52].mxu1 %v5115_v15  ;;  %v663_v52 = vmax.f32 %v607_v56, 0.0  ;;  %v611_v59 = vadd.f32 %v610_v28, %v5147_v63  ;;  %v612_v60 = vpop.f32.mrb[43].mxu1  ;;  %v4532_v56 = vld [vmem:[#allocation4 + $0x50c] ss:$16 sps:$4 sm:$0xff]   ;;  %v4535_v28 = vld [vmem:[#allocation4 + $0x524] ss:$16 sps:$4 sm:$0xff]  }
 0x172   :  { %2430 = vmatpush1.bf16.msra.mxu0 %v4491_v1  ;;  %2722 = vmatpush1.bf16.msra.mxu1 %v4494_v48  ;;  %v664_v21 = vmax.f32 %v609_v19, 0.0  ;;  %v613_v2 = vadd.f32 %v612_v60, %v5150_v45  ;;  %v4518_v1 = vld [vmem:[#allocation4 + $0x4c8] ss:$16 sps:$4 sm:$0xff]   ;;  %v4541_v60 = vld [vmem:[#allocation4 + $0x544] ss:$16 sps:$4 sm:$0xff]  }
 0x173   :  { %2431 = vmatprep.subr.bf16.mxu0 %v4499_v35  ;;  %2723 = vmatprep.subr.bf16.mxu1 %v4502_v55  ;;  %v671_v5 = vmax.f32 %v611_v59, 0.0  ;;  %v4524_v35 = vld [vmem:[#allocation4 + $0x4e8] ss:$16 sps:$4 sm:$0xff]   ;;  %v4529_v55 = vld [vmem:[#allocation4 + $0x504] ss:$16 sps:$4 sm:$0xff]  }
 0x174   :  { %2404 = vmatprep.mubr.bf16.mxu0 %v5134_v7  ;;  %2696 = vmatprep.mubr.bf16.mxu1 %v5134_v7  ;;  %v672_v15 = vmax.f32 %v613_v2, 0.0  ;;  %v4530_v19 = vld [vmem:[#allocation4 + $0x508] ss:$16 sps:$4 sm:$0xff]   ;;  %v4550_v2 = vld [vmem:[#allocation4 + $0x56c] ss:$16 sps:$4 sm:$0xff]  }
 0x175   :  { %v5184_v6 = vpack.c.bf16 %v671_v5, %v663_v52  ;;  %v4533_v52 = vld [vmem:[#allocation4 + $0x520] ss:$16 sps:$4 sm:$0xff]   ;;  %v4536_v59 = vld [vmem:[#allocation4 + $0x528] ss:$16 sps:$4 sm:$0xff]   ;;  %v4553_v5 = vld [vmem:[#allocation4 + $0x584] ss:$16 sps:$4 sm:$0xff]  }
 0x176   :  { %2432 = vmatpush1.bf16.msra.mxu0 %v4497_v61  ;;  %2724 = vmatpush1.bf16.msra.mxu1 %v4500_v62  ;;  %v5186_v39 = vpack.c.bf16 %v672_v15, %v664_v21  ;;  %v616_v12 = vpop.f32.mrb[44].mxu1  ;;  %v4544_v61 = vld [vmem:[#allocation4 + $0x54c] ss:$16 sps:$4 sm:$0xff]   ;;  %v4539_v62 = vld [vmem:[#allocation4 + $0x540] ss:$16 sps:$4 sm:$0xff]  }
 0x177   :  { %2433 = vmatprep.subr.bf16.mxu0 %v4505_v3  ;;  %2725 = vmatprep.subr.bf16.mxu1 %v4508_v4  ;;  %v617_v16 = vadd.f32 %v616_v12, %v5147_v63  ;;  %v618_v23 = vpop.f32.mrb[45].mxu1  ;;  %v4547_v21 = vld [vmem:[#allocation4 + $0x564] ss:$16 sps:$4 sm:$0xff]   ;;  %v4545_v3 = vld [vmem:[#allocation4 + $0x560] ss:$16 sps:$4 sm:$0xff]  }
 0x178   :  { %v619_v25 = vadd.f32 %v618_v23, %v5150_v45  ;;  %v620_v7 = vpop.f32.mrb[46].mxu1  ;;  %v4548_v4 = vld [vmem:[#allocation4 + $0x568] ss:$16 sps:$4 sm:$0xff]   ;;  %v4556_v15 = vld [vmem:[#allocation4 + $0x58c] ss:$16 sps:$4 sm:$0xff]  }
 0x179   :  { %2405 = vmatmul.mubr.bf16.gmra.mrb[24].mxu0 %v5131_v22  ;;  %2697 = vmatmul.mubr.bf16.gmra.mrb[56].mxu1 %v5131_v22  ;;  %v679_v26 = vmax.f32 %v617_v16, 0.0  ;;  %v621_v29 = vadd.f32 %v620_v7, %v5147_v63  ;;  %v622_v31 = vpop.f32.mrb[47].mxu1  ;;  %v4515_v63 = vld [vmem:[#allocation4 + $0x4c0] ss:$16 sps:$4 sm:$0xff]   ;;  %v4559_v12 = vld [vmem:[#allocation4 + $0x5a4] ss:$16 sps:$4 sm:$0xff]  }
 0x17a   :  { %2434 = vmatpush1.bf16.msra.mxu0 %v4503_v9  ;;  %2726 = vmatpush1.bf16.msra.mxu1 %v4506_v10  ;;  %v680_v34 = vmax.f32 %v619_v25, 0.0  ;;  %v623_v36 = vadd.f32 %v622_v31, %v5150_v45  ;;  %v4523_v45 = vld [vmem:[#allocation4 + $0x4e4] ss:$16 sps:$4 sm:$0xff]   ;;  %v4551_v9 = vld [vmem:[#allocation4 + $0x580] ss:$16 sps:$4 sm:$0xff]  }
 0x17b   :  { %2435 = vmatprep.subr.bf16.mxu0 %v4511_v13  ;;  %2727 = vmatprep.subr.bf16.mxu1 %v4514_v14  ;;  %v687_v42 = vmax.f32 %v621_v29, 0.0  ;;  %v4554_v10 = vld [vmem:[#allocation4 + $0x588] ss:$16 sps:$4 sm:$0xff]   ;;  %v4562_v13 = vld [vmem:[#allocation4 + $0x5ac] ss:$16 sps:$4 sm:$0xff]  }
 0x17c   :  { %2414 = vmatprep.mubr.bf16.mxu0 %v5154_v49  ;;  %2706 = vmatprep.mubr.bf16.mxu1 %v5154_v49  ;;  %v688_v22 = vmax.f32 %v623_v36, 0.0  ;;  %v4521_v49 = vld [vmem:[#allocation4 + $0x4e0] ss:$16 sps:$4 sm:$0xff]   ;;  %v4560_v16 = vld [vmem:[#allocation4 + $0x5a8] ss:$16 sps:$4 sm:$0xff]  }
 0x17d   :  { %v5196_v41 = vpack.c.bf16 %v687_v42, %v679_v26  ;;  %v4557_v14 = vld [vmem:[#allocation4 + $0x5a0] ss:$16 sps:$4 sm:$0xff]   ;;  %v4565_v23 = vld [vmem:[#allocation4 + $0x5c4] ss:$16 sps:$4 sm:$0xff]   ;;  %v4568_v25 = vld [vmem:[#allocation4 + $0x5cc] ss:$16 sps:$4 sm:$0xff]  }
 0x17e   :  { %2436 = vmatpush1.bf16.msra.mxu0 %v4509_v32  ;;  %2728 = vmatpush1.bf16.msra.mxu1 %v4512_v33  ;;  %v5198_v48 = vpack.c.bf16 %v688_v22, %v680_v34  ;;  %v4563_v7 = vld [vmem:[#allocation4 + $0x5c0] ss:$16 sps:$4 sm:$0xff]   ;;  %v4566_v26 = vld [vmem:[#allocation4 + $0x5c8] ss:$16 sps:$4 sm:$0xff]   ;;  %v4571_v29 = vld [vmem:[#allocation4 + $0x5e4] ss:$16 sps:$4 sm:$0xff]  }
 0x17f   :  { %2437 = vmatprep.subr.bf16.mxu0 %v4517_v37  ;;  %2729 = vmatprep.subr.bf16.mxu1 %v4520_v38  ;;  %v4574_v31 = vld [vmem:[#allocation4 + $0x5ec] ss:$16 sps:$4 sm:$0xff]   ;;  %v4569_v32 = vld [vmem:[#allocation4 + $0x5e0] ss:$16 sps:$4 sm:$0xff]   ;;  %v4572_v33 = vld [vmem:[#allocation4 + $0x5e8] ss:$16 sps:$4 sm:$0xff]  }
 0x180   :  { %v4577_v34 = vld [vmem:[#allocation4 + $0x604] ss:$16 sps:$4 sm:$0xff]   ;;  %v4580_v36 = vld [vmem:[#allocation4 + $0x60c] ss:$16 sps:$4 sm:$0xff]   ;;  %v4575_v37 = vld [vmem:[#allocation4 + $0x600] ss:$16 sps:$4 sm:$0xff]  }
 0x181   :  { %2415 = vmatmul.mubr.bf16.gmra.mrb[28].mxu0 %v5152_v46  ;;  %2707 = vmatmul.mubr.bf16.gmra.mrb[60].mxu1 %v5152_v46  ;;  %v4538_v46 = vld [vmem:[#allocation4 + $0x52c] ss:$16 sps:$4 sm:$0xff]   ;;  %v4578_v38 = vld [vmem:[#allocation4 + $0x608] ss:$16 sps:$4 sm:$0xff]   ;;  %v4583_v42 = vld [vmem:[#allocation4 + $0x624] ss:$16 sps:$4 sm:$0xff]  }
 0x182   :  { %2438 = vmatpush1.bf16.msra.mxu0 %v4515_v63  ;;  %2730 = vmatpush1.bf16.msra.mxu1 %v4518_v1  ;;  %v4586_v22 = vld [vmem:[#allocation4 + $0x62c] ss:$16 sps:$4 sm:$0xff]   ;;  %v4581_v63 = vld [vmem:[#allocation4 + $0x620] ss:$16 sps:$4 sm:$0xff]   ;;  %v4584_v1 = vld [vmem:[#allocation4 + $0x628] ss:$16 sps:$4 sm:$0xff]  }
 0x183   :  { %2439 = vmatprep.subr.bf16.mxu0 %v4523_v45  ;;  %2731 = vmatprep.subr.bf16.mxu1 %v4526_v53  ;;  %v4589_v45 = vld [vmem:[#allocation4 + $0x644] ss:$16 sps:$4 sm:$0xff]   ;;  %v4592_v53 = vld [vmem:[#allocation4 + $0x64c] ss:$16 sps:$4 sm:$0xff]  }
 0x184   :  { %2457 = vmatprep.mubr.bf16.mxu0 %v5074_v27  ;;  %2749 = vmatprep.mubr.bf16.mxu1 %v5074_v27  ;;  %v4542_v27 = vld [vmem:[#allocation4 + $0x548] ss:$16 sps:$4 sm:$0xff]  }
 0x186   :  { %2440 = vmatpush1.bf16.msra.mxu0 %v4521_v49  ;;  %2732 = vmatpush1.bf16.msra.mxu1 %v4524_v35  ;;  %v4587_v49 = vld [vmem:[#allocation4 + $0x640] ss:$16 sps:$4 sm:$0xff]   ;;  %v4590_v35 = vld [vmem:[#allocation4 + $0x648] ss:$16 sps:$4 sm:$0xff]  }
 0x187   :  { %2441 = vmatprep.subr.bf16.mxu0 %v4529_v55  ;;  %2733 = vmatprep.subr.bf16.mxu1 %v4532_v56  ;;  %v4595_v55 = vld [vmem:[#allocation4 + $0x664] ss:$16 sps:$4 sm:$0xff]   ;;  %v4593_v56 = vld [vmem:[#allocation4 + $0x660] ss:$16 sps:$4 sm:$0xff]  }
 0x18a   :  { %2442 = vmatpush1.bf16.msra.mxu0 %v4527_v57  ;;  %2734 = vmatpush1.bf16.msra.mxu1 %v4530_v19  ;;  %v4596_v57 = vld [vmem:[#allocation4 + $0x668] ss:$16 sps:$4 sm:$0xff]   ;;  %v4601_v19 = vld [vmem:[#allocation4 + $0x684] ss:$16 sps:$4 sm:$0xff]  }
 0x18b   :  { %2443 = vmatprep.subr.bf16.mxu0 %v4535_v28  ;;  %2735 = vmatprep.subr.bf16.mxu1 %v4538_v46  ;;  %v4599_v28 = vld [vmem:[#allocation4 + $0x680] ss:$16 sps:$4 sm:$0xff]   ;;  %v4602_v46 = vld [vmem:[#allocation4 + $0x688] ss:$16 sps:$4 sm:$0xff]  }
 0x18e   :  { %2444 = vmatpush1.bf16.msra.mxu0 %v4533_v52  ;;  %2736 = vmatpush1.bf16.msra.mxu1 %v4536_v59  ;;  %v4607_v52 = vld [vmem:[#allocation4 + $0x6a4] ss:$16 sps:$4 sm:$0xff]   ;;  %v4605_v59 = vld [vmem:[#allocation4 + $0x6a0] ss:$16 sps:$4 sm:$0xff]  }
 0x18f   :  { %2445 = vmatprep.subr.bf16.mxu0 %v4541_v60  ;;  %2737 = vmatprep.subr.bf16.mxu1 %v4544_v61  ;;  %v4608_v60 = vld [vmem:[#allocation4 + $0x6a8] ss:$16 sps:$4 sm:$0xff]   ;;  %v4613_v61 = vld [vmem:[#allocation4 + $0x6c4] ss:$16 sps:$4 sm:$0xff]  }
 0x192   :  { %2446 = vmatpush1.bf16.msra.mxu0 %v4539_v62  ;;  %2738 = vmatpush1.bf16.msra.mxu1 %v4542_v27  ;;  %v4611_v62 = vld [vmem:[#allocation4 + $0x6c0] ss:$16 sps:$4 sm:$0xff]   ;;  %v4614_v27 = vld [vmem:[#allocation4 + $0x6c8] ss:$16 sps:$4 sm:$0xff]  }
 0x193   :  { %2447 = vmatprep.subr.bf16.mxu0 %v4547_v21  ;;  %2739 = vmatprep.subr.bf16.mxu1 %v4550_v2  ;;  %v4619_v21 = vld [vmem:[#allocation4 + $0x6e4] ss:$16 sps:$4 sm:$0xff]   ;;  %v4617_v2 = vld [vmem:[#allocation4 + $0x6e0] ss:$16 sps:$4 sm:$0xff]  }
 0x196   :  { %2448 = vmatpush1.bf16.msra.mxu0 %v4545_v3  ;;  %2740 = vmatpush1.bf16.msra.mxu1 %v4548_v4  ;;  %v4620_v3 = vld [vmem:[#allocation4 + $0x6e8] ss:$16 sps:$4 sm:$0xff]   ;;  %v4625_v4 = vld [vmem:[#allocation4 + $0x704] ss:$16 sps:$4 sm:$0xff]  }
 0x197   :  { %2449 = vmatprep.subr.bf16.mxu0 %v4553_v5  ;;  %2741 = vmatprep.subr.bf16.mxu1 %v4556_v15  ;;  %v4623_v5 = vld [vmem:[#allocation4 + $0x700] ss:$16 sps:$4 sm:$0xff]   ;;  %v4626_v15 = vld [vmem:[#allocation4 + $0x708] ss:$16 sps:$4 sm:$0xff]  }
 0x19a   :  { %2450 = vmatpush1.bf16.msra.mxu0 %v4551_v9  ;;  %2742 = vmatpush1.bf16.msra.mxu1 %v4554_v10  ;;  %v4631_v9 = vld [vmem:[#allocation4 + $0x724] ss:$16 sps:$4 sm:$0xff]   ;;  %v4629_v10 = vld [vmem:[#allocation4 + $0x720] ss:$16 sps:$4 sm:$0xff]  }
 0x19b   :  { %2451 = vmatprep.subr.bf16.mxu0 %v4559_v12  ;;  %2743 = vmatprep.subr.bf16.mxu1 %v4562_v13  ;;  %v4632_v12 = vld [vmem:[#allocation4 + $0x728] ss:$16 sps:$4 sm:$0xff]   ;;  %v4637_v13 = vld [vmem:[#allocation4 + $0x744] ss:$16 sps:$4 sm:$0xff]  }
 0x19e   :  { %2452 = vmatpush1.bf16.msra.mxu0 %v4557_v14  ;;  %2744 = vmatpush1.bf16.msra.mxu1 %v4560_v16  ;;  %v4640_v14 = vld [vmem:[#allocation4 + $0x74c] ss:$16 sps:$4 sm:$0xff]   ;;  %v4635_v16 = vld [vmem:[#allocation4 + $0x740] ss:$16 sps:$4 sm:$0xff]  }
 0x19f   :  { %2453 = vmatprep.subr.bf16.mxu0 %v4565_v23  ;;  %2745 = vmatprep.subr.bf16.mxu1 %v4568_v25  ;;  %v4643_v23 = vld [vmem:[#allocation4 + $0x764] ss:$16 sps:$4 sm:$0xff]   ;;  %v4646_v25 = vld [vmem:[#allocation4 + $0x76c] ss:$16 sps:$4 sm:$0xff]  }
 0x1a2   :  { %2454 = vmatpush1.bf16.msra.mxu0 %v4563_v7  ;;  %2746 = vmatpush1.bf16.msra.mxu1 %v4566_v26  ;;  %v4641_v7 = vld [vmem:[#allocation4 + $0x760] ss:$16 sps:$4 sm:$0xff]   ;;  %v4644_v26 = vld [vmem:[#allocation4 + $0x768] ss:$16 sps:$4 sm:$0xff]  }
 0x1a3   :  { %2455 = vmatprep.subr.bf16.mxu0 %v4571_v29  ;;  %2747 = vmatprep.subr.bf16.mxu1 %v4574_v31  ;;  %v4649_v29 = vld [vmem:[#allocation4 + $0x784] ss:$16 sps:$4 sm:$0xff]   ;;  %v4652_v31 = vld [vmem:[#allocation4 + $0x78c] ss:$16 sps:$4 sm:$0xff]  }
 0x1a6   :  { %2456 = vmatpush1.bf16.msra.mxu0 %v4569_v32  ;;  %2748 = vmatpush1.bf16.msra.mxu1 %v4572_v33  ;;  %v4647_v32 = vld [vmem:[#allocation4 + $0x780] ss:$16 sps:$4 sm:$0xff]   ;;  %v4650_v33 = vld [vmem:[#allocation4 + $0x788] ss:$16 sps:$4 sm:$0xff]  }
 0x1a7   :  { %2498 = vmatprep.subr.bf16.mxu0 %v4577_v34  ;;  %2790 = vmatprep.subr.bf16.mxu1 %v4580_v36  ;;  %v4655_v34 = vld [vmem:[#allocation4 + $0x7a4] ss:$16 sps:$4 sm:$0xff]   ;;  %v4658_v36 = vld [vmem:[#allocation4 + $0x7ac] ss:$16 sps:$4 sm:$0xff]  }
 0x1a9   :  { %2458 = vmatmul.mubr.bf16.vlgmr.msra.gmra.mrb[16].mxu0 %v5071_v24  ;;  %2750 = vmatmul.mubr.bf16.vlgmr.msra.gmra.mrb[48].mxu1 %v5071_v24  ;;  %v4598_v24 = vld [vmem:[#allocation4 + $0x66c] ss:$16 sps:$4 sm:$0xff]  }
 0x1aa   :  { %2499 = vmatpush1.bf16.msra.mxu0 %v4575_v37  ;;  %2791 = vmatpush1.bf16.msra.mxu1 %v4578_v38  ;;  %v4653_v37 = vld [vmem:[#allocation4 + $0x7a0] ss:$16 sps:$4 sm:$0xff]   ;;  %v4656_v38 = vld [vmem:[#allocation4 + $0x7a8] ss:$16 sps:$4 sm:$0xff]  }
 0x1ab   :  { %2500 = vmatprep.subr.bf16.mxu0 %v4583_v42  ;;  %2792 = vmatprep.subr.bf16.mxu1 %v4586_v22  ;;  %v4661_v42 = vld [vmem:[#allocation4 + $0x7c4] ss:$16 sps:$4 sm:$0xff]   ;;  %v4664_v22 = vld [vmem:[#allocation4 + $0x7cc] ss:$16 sps:$4 sm:$0xff]  }
 0x1ac   :  { %2467 = vmatprep.mubr.bf16.mxu0 %v5109_v0  ;;  %2759 = vmatprep.mubr.bf16.mxu1 %v5109_v0  ;;  %v4604_v0 = vld [vmem:[#allocation4 + $0x68c] ss:$16 sps:$4 sm:$0xff]  }
 0x1ae   :  { %2501 = vmatpush1.bf16.msra.mxu0 %v4581_v63  ;;  %2793 = vmatpush1.bf16.msra.mxu1 %v4584_v1  ;;  %v4659_v63 = vld [vmem:[#allocation4 + $0x7c0] ss:$16 sps:$4 sm:$0xff]   ;;  %v4662_v1 = vld [vmem:[#allocation4 + $0x7c8] ss:$16 sps:$4 sm:$0xff]  }
 0x1af   :  { %2502 = vmatprep.subr.bf16.mxu0 %v4589_v45  ;;  %2794 = vmatprep.subr.bf16.mxu1 %v4592_v53  ;;  %v4667_v45 = vld [vmem:[#allocation4 + $0x7e4] ss:$16 sps:$4 sm:$0xff]   ;;  %v4670_v53 = vld [vmem:[#allocation4 + $0x7ec] ss:$16 sps:$4 sm:$0xff]  }
 0x1b1   :  { %2468 = vmatmul.mubr.bf16.gmra.mrb[20].mxu0 %v5106_v58  ;;  %2760 = vmatmul.mubr.bf16.gmra.mrb[52].mxu1 %v5106_v58  ;;  %v4610_v58 = vld [vmem:[#allocation4 + $0x6ac] ss:$16 sps:$4 sm:$0xff]  }
 0x1b2   :  { %2503 = vmatpush1.bf16.msra.mxu0 %v4587_v49  ;;  %2795 = vmatpush1.bf16.msra.mxu1 %v4590_v35  ;;  %v4665_v49 = vld [vmem:[#allocation4 + $0x7e0] ss:$16 sps:$4 sm:$0xff]   ;;  %v4668_v35 = vld [vmem:[#allocation4 + $0x7e8] ss:$16 sps:$4 sm:$0xff]  }
 0x1b3   :  { %2504 = vmatprep.subr.bf16.mxu0 %v4595_v55  ;;  %2796 = vmatprep.subr.bf16.mxu1 %v4598_v24  ;;  %v4673_v55 = vld [vmem:[#allocation6 + $0x4] ss:$8 sps:$4 sm:$0xff]   ;;  %v4671_v24 = vld [vmem:[#allocation6] ss:$8 sps:$4 sm:$0xff]  }
 0x1b4   :  { %2477 = vmatprep.mubr.bf16.mxu0 %v5125_v47  ;;  %2769 = vmatprep.mubr.bf16.mxu1 %v5125_v47  ;;  %v4616_v47 = vld [vmem:[#allocation4 + $0x6cc] ss:$16 sps:$4 sm:$0xff]  }
 0x1b6   :  { %2505 = vmatpush1.bf16.msra.mxu0 %v4593_v56  ;;  %2797 = vmatpush1.bf16.msra.mxu1 %v4596_v57  ;;  %v4676_v56 = vld [vmem:[#allocation6 + $0x14] ss:$8 sps:$4 sm:$0xff]   ;;  %v4674_v57 = vld [vmem:[#allocation6 + $0x10] ss:$8 sps:$4 sm:$0xff]  }
 0x1b7   :  { %2506 = vmatprep.subr.bf16.mxu0 %v4601_v19  ;;  %2798 = vmatprep.subr.bf16.mxu1 %v4604_v0  ;;  %v4679_v19 = vld [vmem:[#allocation6 + $0x24] ss:$8 sps:$4 sm:$0xff]   ;;  %v4677_v0 = vld [vmem:[#allocation6 + $0x20] ss:$8 sps:$4 sm:$0xff]  }
 0x1b9   :  { %2478 = vmatmul.mubr.bf16.gmra.mrb[24].mxu0 %v5122_v40  ;;  %2770 = vmatmul.mubr.bf16.gmra.mrb[56].mxu1 %v5122_v40  ;;  %v4622_v40 = vld [vmem:[#allocation4 + $0x6ec] ss:$16 sps:$4 sm:$0xff]  }
 0x1ba   :  { %2507 = vmatpush1.bf16.msra.mxu0 %v4599_v28  ;;  %2799 = vmatpush1.bf16.msra.mxu1 %v4602_v46  ;;  %v4682_v28 = vld [vmem:[#allocation6 + $0x34] ss:$8 sps:$4 sm:$0xff]   ;;  %v4683_v46 = vld [vmem:[#allocation6 + $0x40] ss:$8 sps:$4 sm:$0xff]  }
 0x1bb   :  { %2508 = vmatprep.subr.bf16.mxu0 %v4607_v52  ;;  %2800 = vmatprep.subr.bf16.mxu1 %v4610_v58  ;;  %v4688_v52 = vld [vmem:[#allocation6 + $0x54] ss:$8 sps:$4 sm:$0xff]   ;;  %v4689_v58 = vld [vmem:[#allocation6 + $0x60] ss:$8 sps:$4 sm:$0xff]  }
 0x1bc   :  { %2487 = vmatprep.mubr.bf16.mxu0 %v5141_v30  ;;  %2779 = vmatprep.mubr.bf16.mxu1 %v5141_v30  ;;  %v4628_v30 = vld [vmem:[#allocation4 + $0x70c] ss:$16 sps:$4 sm:$0xff]  }
 0x1be   :  { %2509 = vmatpush1.bf16.msra.mxu0 %v4605_v59  ;;  %2801 = vmatpush1.bf16.msra.mxu1 %v4608_v60  ;;  %v4694_v59 = vld [vmem:[#allocation6 + $0x74] ss:$8 sps:$4 sm:$0xff]   ;;  %v4692_v60 = vld [vmem:[#allocation6 + $0x70] ss:$8 sps:$4 sm:$0xff]  }
 0x1bf   :  { %2510 = vmatprep.subr.bf16.mxu0 %v4613_v61  ;;  %2802 = vmatprep.subr.bf16.mxu1 %v4616_v47  ;;  %v4695_v61 = vld [vmem:[#allocation6 + $0x80] ss:$8 sps:$4 sm:$0xff]   ;;  %v4698_v47 = vld [vmem:[#allocation6 + $0x90] ss:$8 sps:$4 sm:$0xff]  }
 0x1c1   :  { %2488 = vmatmul.mubr.bf16.gmra.mrb[28].mxu0 %v5138_v44  ;;  %2780 = vmatmul.mubr.bf16.gmra.mrb[60].mxu1 %v5138_v44  ;;  %v4634_v44 = vld [vmem:[#allocation4 + $0x72c] ss:$16 sps:$4 sm:$0xff]  }
 0x1c2   :  { %2511 = vmatpush1.bf16.msra.mxu0 %v4611_v62  ;;  %2803 = vmatpush1.bf16.msra.mxu1 %v4614_v27  ;;  %v4703_v62 = vld [vmem:[#allocation6 + $0xa4] ss:$8 sps:$4 sm:$0xff]   ;;  %v4701_v27 = vld [vmem:[#allocation6 + $0xa0] ss:$8 sps:$4 sm:$0xff]  }
 0x1c3   :  { %2512 = vmatprep.subr.bf16.mxu0 %v4619_v21  ;;  %2804 = vmatprep.subr.bf16.mxu1 %v4622_v40  ;;  %v4706_v21 = vld [vmem:[#allocation6 + $0xb4] ss:$8 sps:$4 sm:$0xff]   ;;  %v4704_v40 = vld [vmem:[#allocation6 + $0xb0] ss:$8 sps:$4 sm:$0xff]  }
 0x1c4   :  { %2530 = vmatprep.mubr.bf16.mxu0 %v5162_v11  ;;  %2822 = vmatprep.mubr.bf16.mxu1 %v5162_v11  ;;  %v4638_v11 = vld [vmem:[#allocation4 + $0x748] ss:$16 sps:$4 sm:$0xff]  }
 0x1c6   :  { %2513 = vmatpush1.bf16.msra.mxu0 %v4617_v2  ;;  %2805 = vmatpush1.bf16.msra.mxu1 %v4620_v3  ;;  %v4707_v2 = vld [vmem:[#allocation6 + $0xc0] ss:$8 sps:$4 sm:$0xff]   ;;  %v4712_v3 = vld [vmem:[#allocation6 + $0xd4] ss:$8 sps:$4 sm:$0xff]  }
 0x1c7   :  { %2514 = vmatprep.subr.bf16.mxu0 %v4625_v4  ;;  %2806 = vmatprep.subr.bf16.mxu1 %v4628_v30  ;;  %v4710_v4 = vld [vmem:[#allocation6 + $0xd0] ss:$8 sps:$4 sm:$0xff]   ;;  %v4715_v30 = vld [vmem:[#allocation6 + $0xe4] ss:$8 sps:$4 sm:$0xff]  }
 0x1ca   :  { %2515 = vmatpush1.bf16.msra.mxu0 %v4623_v5  ;;  %2807 = vmatpush1.bf16.msra.mxu1 %v4626_v15  ;;  %v4713_v5 = vld [vmem:[#allocation6 + $0xe0] ss:$8 sps:$4 sm:$0xff]   ;;  %v4718_v15 = vld [vmem:[#allocation6 + $0xf4] ss:$8 sps:$4 sm:$0xff]  }
 0x1cb   :  { %2516 = vmatprep.subr.bf16.mxu0 %v4631_v9  ;;  %2808 = vmatprep.subr.bf16.mxu1 %v4634_v44  ;;  %v4716_v9 = vld [vmem:[#allocation6 + $0xf0] ss:$8 sps:$4 sm:$0xff]   ;;  %v4721_v44 = vld [vmem:[#allocation6 + $0x104] ss:$8 sps:$4 sm:$0xff]  }
 0x1ce   :  { %2517 = vmatpush1.bf16.msra.mxu0 %v4629_v10  ;;  %2809 = vmatpush1.bf16.msra.mxu1 %v4632_v12  ;;  %v4767_v10 = vld [vmem:[%s5396_s7 + $0x40] sm:$0xff]  }
 0x1cf   :  { %2518 = vmatprep.subr.bf16.mxu0 %v4637_v13  ;;  %2810 = vmatprep.subr.bf16.mxu1 %v4640_v14  ;;  %v4768_v12 = vld [vmem:[%s5396_s7] sm:$0xff]   ;;  %v4769_v13 = vld [vmem:[%s5396_s7 + $0x48] sm:$0xff]  }
 0x1d0   :  { %v4770_v14 = vld [vmem:[%s5396_s7 + $0x8] sm:$0xff]  }
 0x1d2   :  { %2519 = vmatpush1.bf16.msra.mxu0 %v4635_v16  ;;  %2811 = vmatpush1.bf16.msra.mxu1 %v4638_v11  ;;  %v4771_v16 = vld [vmem:[%s5396_s7 + $0x50] sm:$0xff]  }
 0x1d3   :  { %2520 = vmatprep.subr.bf16.mxu0 %v4643_v23  ;;  %2812 = vmatprep.subr.bf16.mxu1 %v4646_v25  ;;  %v4772_v11 = vld [vmem:[%s5396_s7 + $0x10] sm:$0xff]   ;;  %v4773_v23 = vld [vmem:[%s5396_s7 + $0x58] sm:$0xff]  }
 0x1d4   :  { %v4774_v25 = vld [vmem:[%s5396_s7 + $0x18] sm:$0xff]  }
 0x1d6   :  { %2521 = vmatpush1.bf16.msra.mxu0 %v4641_v7  ;;  %2813 = vmatpush1.bf16.msra.mxu1 %v4644_v26  ;;  %v4775_v7 = vld [vmem:[%s5396_s7 + $0x60] sm:$0xff]  }
 0x1d7   :  { %2522 = vmatprep.subr.bf16.mxu0 %v4649_v29  ;;  %2814 = vmatprep.subr.bf16.mxu1 %v4652_v31  ;;  %v4776_v26 = vld [vmem:[%s5396_s7 + $0x20] sm:$0xff]   ;;  %v4777_v29 = vld [vmem:[%s5396_s7 + $0x68] sm:$0xff]  }
 0x1d8   :  { %v4778_v31 = vld [vmem:[%s5396_s7 + $0x28] sm:$0xff]  }
 0x1da   :  { %2523 = vmatpush1.bf16.msra.mxu0 %v4647_v32  ;;  %2815 = vmatpush1.bf16.msra.mxu1 %v4650_v33  ;;  %v977_v32 = vld [vmem:[%s5393_s4] sm:$0xf] }
 0x1db   :  { %2524 = vmatprep.subr.bf16.mxu0 %v4655_v34  ;;  %2816 = vmatprep.subr.bf16.mxu1 %v4658_v36  ;;  %v5274_v33 = vrot.slane %v977_v32, %v5032_v18  ;;  %v5278_v34 = vrot.slane %v977_v32, %v130_v51  ;;  %v5281_v36 = vrot.slane %v977_v32, %v5040_v20 }
 0x1de   :  { %2525 = vmatpush1.bf16.msra.mxu0 %v4653_v37  ;;  %2817 = vmatpush1.bf16.msra.mxu1 %v4656_v38  ;;  %v5285_v37 = vrot.slane %v977_v32, %v134_v54 }
 0x1df   :  { %2526 = vmatprep.subr.bf16.mxu0 %v4661_v42  ;;  %2818 = vmatprep.subr.bf16.mxu1 %v4664_v22 }
 0x1e2   :  { %2527 = vmatpush1.bf16.msra.mxu0 %v4659_v63  ;;  %2819 = vmatpush1.bf16.msra.mxu1 %v4662_v1 }
 0x1e3   :  { %2528 = vmatprep.subr.bf16.mxu0 %v4667_v45  ;;  %2820 = vmatprep.subr.bf16.mxu1 %v4670_v53 }
 0x1e6   :  { %2529 = vmatpush1.bf16.msra.mxu0 %v4665_v49  ;;  %2821 = vmatpush1.bf16.msra.mxu1 %v4668_v35 }
 0x1e7   :  { %3307 = vmatprep.subr.bf16.mxu0 %v4673_v55  ;;  %4077 = vmatprep.subr.bf16.mxu1 %v4767_v10 }
 0x1e9   :  { %2531 = vmatmul.mubr.bf16.vlgmr.msra.gmra.mrb[16].mxu0 %v5160_v8  ;;  %2823 = vmatmul.mubr.bf16.vlgmr.msra.gmra.mrb[48].mxu1 %v5160_v8  ;;  %v4680_v8 = vld [vmem:[#allocation6 + $0x30] ss:$8 sps:$4 sm:$0xff]  }
 0x1ea   :  { %2540 = vmatprep.mubr.bf16.mxu0 %v5174_v50  ;;  %2832 = vmatprep.mubr.bf16.mxu1 %v5174_v50  ;;  %v4685_v50 = vld [vmem:[#allocation6 + $0x44] ss:$8 sps:$4 sm:$0xff]  }
 0x1eb   :  { %3308 = vmatpush1.bf16.msra.mxu0 %v4671_v24  ;;  %4078 = vmatpush3.bf16.msra.mxu1 %v4768_v12  ;;  %v4722_v12 = vld [vmem:[#allocation6 + $0x110] ss:$8 sps:$4 sm:$0xff]  }
 0x1ec   :  { %3309 = vmatprep.subr.bf16.mxu0 %v4676_v56  ;;  %4079 = vmatprep.subr.bf16.mxu1 %v4769_v13 }
 0x1ef   :  { %3310 = vmatpush1.bf16.msra.mxu0 %v4674_v57  ;;  %4080 = vmatpush3.bf16.msra.mxu1 %v4770_v14 }
 0x1f0   :  { %3311 = vmatprep.subr.bf16.mxu0 %v4679_v19  ;;  %4081 = vmatprep.subr.bf16.mxu1 %v4771_v16 }
 0x1f1   :  { %2541 = vmatmul.mubr.bf16.gmra.mrb[20].mxu0 %v5172_v43  ;;  %2833 = vmatmul.mubr.bf16.gmra.mrb[52].mxu1 %v5172_v43  ;;  %v4686_v43 = vld [vmem:[#allocation6 + $0x50] ss:$8 sps:$4 sm:$0xff]  }
 0x1f2   :  { %2550 = vmatprep.mubr.bf16.mxu0 %v5186_v39  ;;  %2842 = vmatprep.mubr.bf16.mxu1 %v5186_v39  ;;  %v4691_v39 = vld [vmem:[#allocation6 + $0x64] ss:$8 sps:$4 sm:$0xff]  }
 0x1f3   :  { %3312 = vmatpush1.bf16.msra.mxu0 %v4677_v0  ;;  %4082 = vmatpush3.bf16.msra.mxu1 %v4772_v11 }
 0x1f4   :  { %3313 = vmatprep.subr.bf16.mxu0 %v4682_v28  ;;  %4083 = vmatprep.subr.bf16.mxu1 %v4773_v23  ;;  %v4727_v23 = vld [vmem:[#allocation6 + $0x124] ss:$8 sps:$4 sm:$0xff]  }
 0x1f7   :  { %3314 = vmatpush1.bf16.msra.mxu0 %v4680_v8  ;;  %4084 = vmatpush3.bf16.msra.mxu1 %v4774_v25 }
 0x1f8   :  { %3315 = vmatprep.subr.bf16.mxu0 %v4685_v50  ;;  %4085 = vmatprep.subr.bf16.mxu1 %v4775_v7 }
 0x1f9   :  { %2551 = vmatmul.mubr.bf16.gmra.mrb[24].mxu0 %v5184_v6  ;;  %2843 = vmatmul.mubr.bf16.gmra.mrb[56].mxu1 %v5184_v6  ;;  %v4697_v6 = vld [vmem:[#allocation6 + $0x84] ss:$8 sps:$4 sm:$0xff]  }
 0x1fa   :  { %2560 = vmatprep.mubr.bf16.mxu0 %v5198_v48  ;;  %2852 = vmatprep.mubr.bf16.mxu1 %v5198_v48  ;;  %v4700_v48 = vld [vmem:[#allocation6 + $0x94] ss:$8 sps:$4 sm:$0xff]  }
 0x1fb   :  { %3316 = vmatpush1.bf16.msra.mxu0 %v4683_v46  ;;  %4086 = vmatpush3.bf16.msra.mxu1 %v4776_v26 }
 0x1fc   :  { %3317 = vmatprep.subr.bf16.mxu0 %v4688_v52  ;;  %4087 = vmatprep.subr.bf16.mxu1 %v4777_v29 }
 0x1ff   :  { %3318 = vmatpush1.bf16.msra.mxu0 %v4686_v43  ;;  %4088 = vmatpush3.bf16.msra.mxu1 %v4778_v31 }
 0x200   :  { %3319 = vmatprep.subr.bf16.mxu0 %v4691_v39 }
 0x201   :  { %2561 = vmatmul.mubr.bf16.gmra.mrb[28].mxu0 %v5196_v41  ;;  %2853 = vmatmul.mubr.bf16.gmra.mrb[60].mxu1 %v5196_v41  ;;  %v4709_v41 = vld [vmem:[#allocation6 + $0xc4] ss:$8 sps:$4 sm:$0xff]  }
 0x203   :  { %3320 = vmatpush1.bf16.msra.mxu0 %v4689_v58 }
 0x204   :  { %3321 = vmatprep.subr.bf16.mxu0 %v4694_v59 }
 0x207   :  { %3322 = vmatpush1.bf16.msra.mxu0 %v4692_v60 }
 0x208   :  { %3323 = vmatprep.subr.bf16.mxu0 %v4697_v6 }
 0x20b   :  { %3324 = vmatpush1.bf16.msra.mxu0 %v4695_v61 }
 0x20c   :  { %3325 = vmatprep.subr.bf16.mxu0 %v4700_v48  ;;  %v4719_v48 = vld [vmem:[#allocation6 + $0x100] ss:$8 sps:$4 sm:$0xff]  }
 0x20f   :  { %3326 = vmatpush1.bf16.msra.mxu0 %v4698_v47 }
 0x210   :  { %3327 = vmatprep.subr.bf16.mxu0 %v4703_v62 }
 0x213   :  { %3328 = vmatpush1.bf16.msra.mxu0 %v4701_v27 }
 0x214   :  { %3329 = vmatprep.subr.bf16.mxu0 %v4706_v21 }
 0x217   :  { %3330 = vmatpush1.bf16.msra.mxu0 %v4704_v40  ;;  %v4724_v40 = vld [vmem:[#allocation6 + $0x114] ss:$8 sps:$4 sm:$0xff]  }
 0x218   :  { %3331 = vmatprep.subr.bf16.mxu0 %v4709_v41 }
 0x21b   :  { %3332 = vmatpush1.bf16.msra.mxu0 %v4707_v2 }
 0x21c   :  { %3333 = vmatprep.subr.bf16.mxu0 %v4712_v3 }
 0x21f   :  { %3334 = vmatpush1.bf16.msra.mxu0 %v4710_v4 }
 0x220   :  { %3335 = vmatprep.subr.bf16.mxu0 %v4715_v30 }
 0x223   :  { %3336 = vmatpush1.bf16.msra.mxu0 %v4713_v5 }
 0x224   :  { %3337 = vmatprep.subr.bf16.mxu0 %v4718_v15 }
 0x227   :  { %3338 = vmatpush1.bf16.msra.mxu0 %v4716_v9 }
 0x228   :  { %3380 = vmatprep.subr.bf16.mxu0 %v4721_v44 }
 0x2bc   :  { %v2532_v38 = vpop.f32.mrb[16].mxu0  ;;  %v2824_v42 = vpop.f32.mrb[48].mxu1 }
 0x2bd   :  { %v4117_v22 = vadd.f32 %v2532_v38, %v5274_v33  ;;  %v4133_v63 = vadd.f32 %v2824_v42, %v5278_v34  ;;  %v2534_v1 = vpop.f32.mrb[17].mxu0  ;;  %v2826_v45 = vpop.f32.mrb[49].mxu1 }
 0x2be   :  { %v4118_v53 = vadd.f32 %v2534_v1, %v5281_v36  ;;  %v4134_v51 = vadd.f32 %v2826_v45, %v5285_v37  ;;  %v2536_v49 = vpop.f32.mrb[18].mxu0  ;;  %v2828_v35 = vpop.f32.mrb[50].mxu1  ;;  %v4725_v1 = vld [vmem:[#allocation6 + $0x120] ss:$8 sps:$4 sm:$0xff]  }
 0x2bf   :  { %v4119_v55 = vadd.f32 %v2536_v49, %v5274_v33  ;;  %v4135_v17 = vadd.f32 %v2828_v35, %v5278_v34  ;;  %v2538_v54 = vpop.f32.mrb[19].mxu0  ;;  %v2830_v24 = vpop.f32.mrb[51].mxu1  ;;  %v2863_v19 = vmax.f32 %v4117_v22, 0.0  ;;  %v2865_v0 = vmax.f32 %v4133_v63, 0.0  ;;  %v4730_v35 = vld [vmem:[#allocation6 + $0x134] ss:$8 sps:$4 sm:$0xff]  }
 0x2c0   :  { %v4120_v56 = vadd.f32 %v2538_v54, %v5281_v36  ;;  %v4136_v57 = vadd.f32 %v2830_v24, %v5285_v37  ;;  %v2864_v50 = vmax.f32 %v4118_v53, 0.0  ;;  %v2866_v46 = vmax.f32 %v4134_v51, 0.0 }
 0x2c1   :  { %v2867_v28 = vmax.f32 %v4119_v55, 0.0  ;;  %v2869_v8 = vmax.f32 %v4135_v17, 0.0 }
 0x2c2   :  { %v2868_v52 = vmax.f32 %v4120_v56, 0.0  ;;  %v2870_v43 = vmax.f32 %v4136_v57, 0.0 }
 0x2c3   :  { %v2895_v39 = vpack.c.bf16 %v2867_v28, %v2863_v19  ;;  %v5295_v58 = vpack.c.bf16 %v2869_v8, %v2865_v0 }
 0x2c4   :  { %v2896_v59 = vpack.c.bf16 %v2868_v52, %v2864_v50  ;;  %v5297_v60 = vpack.c.bf16 %v2870_v43, %v2866_v46  ;;  %v2542_v6 = vpop.f32.mrb[20].mxu0  ;;  %v2834_v61 = vpop.f32.mrb[52].mxu1  ;;  %v4728_v50 = vld [vmem:[#allocation6 + $0x130] ss:$8 sps:$4 sm:$0xff]  }
 0x2c5   :  { %v4121_v47 = vadd.f32 %v2542_v6, %v5274_v33  ;;  %v4137_v62 = vadd.f32 %v2834_v61, %v5278_v34  ;;  %v2544_v27 = vpop.f32.mrb[21].mxu0  ;;  %v2836_v21 = vpop.f32.mrb[53].mxu1 }
 0x2c6   :  { %v4122_v41 = vadd.f32 %v2544_v27, %v5281_v36  ;;  %v4138_v2 = vadd.f32 %v2836_v21, %v5285_v37  ;;  %v2546_v3 = vpop.f32.mrb[22].mxu0  ;;  %v2838_v4 = vpop.f32.mrb[54].mxu1  ;;  %3339 = vmatprep.mubr.bf16.mxu0 %v2896_v59  ;;  %v4733_v59 = vld [vmem:[#allocation6 + $0x144] ss:$8 sps:$4 sm:$0xff]  }
 0x2c7   :  { %v4123_v30 = vadd.f32 %v2546_v3, %v5274_v33  ;;  %v4139_v5 = vadd.f32 %v2838_v4, %v5278_v34  ;;  %v2548_v15 = vpop.f32.mrb[23].mxu0  ;;  %v2840_v9 = vpop.f32.mrb[55].mxu1  ;;  %3340 = vmatmul.mubr.bf16.vlgmr.msra.gmra.mrb[32].mxu0 %v2895_v39  ;;  %v2871_v13 = vmax.f32 %v4121_v47, 0.0  ;;  %v2873_v14 = vmax.f32 %v4137_v62, 0.0  ;;  %v4731_v3 = vld [vmem:[#allocation6 + $0x140] ss:$8 sps:$4 sm:$0xff]  }
 0x2c8   :  { %v4124_v44 = vadd.f32 %v2548_v15, %v5281_v36  ;;  %v4140_v10 = vadd.f32 %v2840_v9, %v5285_v37  ;;  %3381 = vmatpush1.bf16.msra.mxu0 %v4719_v48  ;;  %v2872_v25 = vmax.f32 %v4122_v41, 0.0  ;;  %v2874_v7 = vmax.f32 %v4138_v2, 0.0  ;;  %v4736_v9 = vld [vmem:[#allocation6 + $0x154] ss:$8 sps:$4 sm:$0xff]  }
 0x2c9   :  { %v2875_v16 = vmax.f32 %v4123_v30, 0.0  ;;  %v2877_v11 = vmax.f32 %v4139_v5, 0.0  ;;  %3382 = vmatprep.subr.bf16.mxu0 %v4724_v40 }
 0x2ca   :  { %v2876_v26 = vmax.f32 %v4124_v44, 0.0  ;;  %v2878_v29 = vmax.f32 %v4140_v10, 0.0 }
 0x2cb   :  { %v2899_v31 = vpack.c.bf16 %v2875_v16, %v2871_v13  ;;  %v5307_v32 = vpack.c.bf16 %v2877_v11, %v2873_v14 }
 0x2cc   :  { %v2900_v38 = vpack.c.bf16 %v2876_v26, %v2872_v25  ;;  %v5309_v42 = vpack.c.bf16 %v2878_v29, %v2874_v7  ;;  %3383 = vmatpush1.bf16.msra.mxu0 %v4722_v12  ;;  %v2552_v22 = vpop.f32.mrb[24].mxu0  ;;  %v2844_v63 = vpop.f32.mrb[56].mxu1  ;;  %v4734_v26 = vld [vmem:[#allocation6 + $0x150] ss:$8 sps:$4 sm:$0xff]  }
 0x2cd   :  { %v4125_v45 = vadd.f32 %v2552_v22, %v5274_v33  ;;  %v4141_v53 = vadd.f32 %v2844_v63, %v5278_v34  ;;  %v2554_v51 = vpop.f32.mrb[25].mxu0  ;;  %v2846_v49 = vpop.f32.mrb[57].mxu1  ;;  %3384 = vmatprep.subr.bf16.mxu0 %v4727_v23  ;;  %v4739_v63 = vld [vmem:[#allocation6 + $0x164] ss:$8 sps:$4 sm:$0xff]  }
 0x2ce   :  { %v4126_v55 = vadd.f32 %v2554_v51, %v5281_v36  ;;  %v4142_v17 = vadd.f32 %v2846_v49, %v5285_v37  ;;  %v2556_v54 = vpop.f32.mrb[26].mxu0  ;;  %v2848_v24 = vpop.f32.mrb[58].mxu1  ;;  %3349 = vmatprep.mubr.bf16.mxu0 %v2900_v38 }
 0x2cf   :  { %v4127_v56 = vadd.f32 %v2556_v54, %v5274_v33  ;;  %v4143_v57 = vadd.f32 %v2848_v24, %v5278_v34  ;;  %v2558_v19 = vpop.f32.mrb[27].mxu0  ;;  %v2850_v0 = vpop.f32.mrb[59].mxu1  ;;  %3350 = vmatmul.mubr.bf16.gmra.mrb[36].mxu0 %v2899_v31  ;;  %v2879_v46 = vmax.f32 %v4125_v45, 0.0  ;;  %v2881_v52 = vmax.f32 %v4141_v53, 0.0  ;;  %v4743_v54 = vld [vmem:[#allocation6 + $0x180] ss:$8 sps:$4 sm:$0xff]  }
 0x2d0   :  { %v4128_v28 = vadd.f32 %v2558_v19, %v5281_v36  ;;  %v4144_v8 = vadd.f32 %v2850_v0, %v5285_v37  ;;  %3385 = vmatpush1.bf16.msra.mxu0 %v4725_v1  ;;  %v2880_v6 = vmax.f32 %v4126_v55, 0.0  ;;  %v2882_v61 = vmax.f32 %v4142_v17, 0.0  ;;  %v4740_v55 = vld [vmem:[#allocation6 + $0x170] ss:$8 sps:$4 sm:$0xff]   ;;  %v4745_v17 = vld [vmem:[#allocation6 + $0x184] ss:$8 sps:$4 sm:$0xff]  }
 0x2d1   :  { %v2883_v43 = vmax.f32 %v4127_v56, 0.0  ;;  %v2885_v39 = vmax.f32 %v4143_v57, 0.0  ;;  %3386 = vmatprep.subr.bf16.mxu0 %v4730_v35  ;;  %v4748_v24 = vld [vmem:[#allocation6 + $0x194] ss:$8 sps:$4 sm:$0xff]   ;;  %v4746_v56 = vld [vmem:[#allocation6 + $0x190] ss:$8 sps:$4 sm:$0xff]  }
 0x2d2   :  { %v2884_v48 = vmax.f32 %v4128_v28, 0.0  ;;  %v2886_v47 = vmax.f32 %v4144_v8, 0.0  ;;  %v4751_v57 = vld [vmem:[#allocation6 + $0x1a4] ss:$8 sps:$4 sm:$0xff]   ;;  %v4749_v19 = vld [vmem:[#allocation6 + $0x1a0] ss:$8 sps:$4 sm:$0xff]  }
 0x2d3   :  { %v2903_v62 = vpack.c.bf16 %v2883_v43, %v2879_v46  ;;  %v5319_v27 = vpack.c.bf16 %v2885_v39, %v2881_v52  ;;  %v4754_v0 = vld [vmem:[#allocation6 + $0x1b4] ss:$8 sps:$4 sm:$0xff]   ;;  %v4752_v28 = vld [vmem:[#allocation6 + $0x1b0] ss:$8 sps:$4 sm:$0xff]   ;;  %v4757_v8 = vld [vmem:[#allocation6 + $0x1c4] ss:$8 sps:$4 sm:$0xff]  }
 0x2d4   :  { %v2904_v21 = vpack.c.bf16 %v2884_v48, %v2880_v6  ;;  %v5321_v40 = vpack.c.bf16 %v2886_v47, %v2882_v61  ;;  %3387 = vmatpush1.bf16.msra.mxu0 %v4728_v50  ;;  %v2562_v41 = vpop.f32.mrb[28].mxu0  ;;  %v2854_v2 = vpop.f32.mrb[60].mxu1  ;;  %v4760_v50 = vld [vmem:[#allocation6 + $0x1d4] ss:$8 sps:$4 sm:$0xff]   ;;  %v4758_v46 = vld [vmem:[#allocation6 + $0x1d0] ss:$8 sps:$4 sm:$0xff]  }
 0x2d5   :  { %v4129_v4 = vadd.f32 %v2562_v41, %v5274_v33  ;;  %v4145_v30 = vadd.f32 %v2854_v2, %v5278_v34  ;;  %v2564_v5 = vpop.f32.mrb[29].mxu0  ;;  %v2856_v15 = vpop.f32.mrb[61].mxu1  ;;  %3388 = vmatprep.subr.bf16.mxu0 %v4733_v59  ;;  %v4763_v52 = vld [vmem:[#allocation6 + $0x1e4] ss:$8 sps:$4 sm:$0xff]   ;;  %v4761_v43 = vld [vmem:[#allocation6 + $0x1e0] ss:$8 sps:$4 sm:$0xff]  }
 0x2d6   :  { %v4130_v44 = vadd.f32 %v2564_v5, %v5281_v36  ;;  %v4146_v10 = vadd.f32 %v2856_v15, %v5285_v37  ;;  %v2566_v12 = vpop.f32.mrb[30].mxu0  ;;  %v2858_v13 = vpop.f32.mrb[62].mxu1  ;;  %3359 = vmatprep.mubr.bf16.mxu0 %v2904_v21  ;;  %v4766_v39 = vld [vmem:[#allocation6 + $0x1f4] ss:$8 sps:$4 sm:$0xff]   ;;  %v4764_v59 = vld [vmem:[#allocation6 + $0x1f0] ss:$8 sps:$4 sm:$0xff]  }
 0x2d7   :  { %v4131_v14 = vadd.f32 %v2566_v12, %v5274_v33  ;;  %v4147_v16 = vadd.f32 %v2858_v13, %v5278_v34  ;;  %v2568_v11 = vpop.f32.mrb[31].mxu0  ;;  %v2860_v23 = vpop.f32.mrb[63].mxu1  ;;  %3360 = vmatmul.mubr.bf16.gmra.mrb[40].mxu0 %v2903_v62  ;;  %v2887_v29 = vmax.f32 %v4129_v4, 0.0  ;;  %v2889_v31 = vmax.f32 %v4145_v30, 0.0  ;;  %v4779_v6 = vld [vmem:[%s5396_s7 + $0x70] sm:$0xff]  }
 0x2d8   :  { %v4132_v25 = vadd.f32 %v2568_v11, %v5281_v36  ;;  %v4148_v7 = vadd.f32 %v2860_v23, %v5285_v37  ;;  %3389 = vmatpush1.bf16.msra.mxu0 %v4731_v3  ;;  %v2888_v1 = vmax.f32 %v4130_v44, 0.0  ;;  %v2890_v45 = vmax.f32 %v4146_v10, 0.0  ;;  %v4737_v36 = vld [vmem:[#allocation6 + $0x160] ss:$8 sps:$4 sm:$0xff]   ;;  %v4742_v37 = vld [vmem:[#allocation6 + $0x174] ss:$8 sps:$4 sm:$0xff]   ;;  %4089 = vmatprep.subr.bf16.mxu1 %v4779_v6 }
 0x2d9   :  { %v2891_v38 = vmax.f32 %v4131_v14, 0.0  ;;  %v2893_v22 = vmax.f32 %v4147_v16, 0.0  ;;  %3390 = vmatprep.subr.bf16.mxu0 %v4736_v9  ;;  %v4780_v61 = vld [vmem:[%s5396_s7 + $0x30] sm:$0xff]   ;;  %v4060_v6 = vld [vmem:[%s5397_s8] ss:$0 sm:$0xff] }
 0x2da   :  { %v2892_v33 = vmax.f32 %v4132_v25, 0.0  ;;  %v2894_v53 = vmax.f32 %v4148_v7, 0.0  ;;  %4090 = vmatpush3.bf16.msra.mxu1 %v4780_v61 }
 0x2db   :  { %v2907_v34 = vpack.c.bf16 %v2891_v38, %v2887_v29  ;;  %v2909_v51 = vpack.c.bf16 %v2893_v22, %v2889_v31 }
 0x2dc   :  { %v2908_v49 = vpack.c.bf16 %v2892_v33, %v2888_v1  ;;  %v2910_v35 = vpack.c.bf16 %v2894_v53, %v2890_v45  ;;  %3391 = vmatpush1.bf16.msra.mxu0 %v4734_v26 }
 0x2dd   :  { %3392 = vmatprep.subr.bf16.mxu0 %v4739_v63 }
 0x2de   :  { %3369 = vmatprep.mubr.bf16.mxu0 %v2908_v49 }
 0x2df   :  { %3370 = vmatmul.mubr.bf16.gmra.mrb[44].mxu0 %v2907_v34 }
 0x2e0   :  { %3393 = vmatpush1.bf16.msra.mxu0 %v4737_v36  ;;  %3412 = vmatprep.mubr.bf16.mxu0 %v5297_v60  ;;  %v4755_v60 = vld [vmem:[#allocation6 + $0x1c0] ss:$8 sps:$4 sm:$0xff]  }
 0x2e1   :  { %3394 = vmatprep.subr.bf16.mxu0 %v4742_v37 }
 0x2e4   :  { %3395 = vmatpush1.bf16.msra.mxu0 %v4740_v55 }
 0x2e5   :  { %3396 = vmatprep.subr.bf16.mxu0 %v4745_v17 }
 0x2e8   :  { %3397 = vmatpush1.bf16.msra.mxu0 %v4743_v54 }
 0x2e9   :  { %3398 = vmatprep.subr.bf16.mxu0 %v4748_v24 }
 0x2ec   :  { %3399 = vmatpush1.bf16.msra.mxu0 %v4746_v56 }
 0x2ed   :  { %3400 = vmatprep.subr.bf16.mxu0 %v4751_v57 }
 0x2f0   :  { %3401 = vmatpush1.bf16.msra.mxu0 %v4749_v19 }
 0x2f1   :  { %3402 = vmatprep.subr.bf16.mxu0 %v4754_v0 }
 0x2f4   :  { %3403 = vmatpush1.bf16.msra.mxu0 %v4752_v28 }
 0x2f5   :  { %3404 = vmatprep.subr.bf16.mxu0 %v4757_v8 }
 0x2f8   :  { %3405 = vmatpush1.bf16.msra.mxu0 %v4755_v60 }
 0x2f9   :  { %3406 = vmatprep.subr.bf16.mxu0 %v4760_v50 }
 0x2fc   :  { %3407 = vmatpush1.bf16.msra.mxu0 %v4758_v46 }
 0x2fd   :  { %3408 = vmatprep.subr.bf16.mxu0 %v4763_v52 }
 0x300   :  { %3409 = vmatpush1.bf16.msra.mxu0 %v4761_v43 }
 0x301   :  { %3410 = vmatprep.subr.bf16.mxu0 %v4766_v39 }
 0x304   :  { %3411 = vmatpush1.bf16.msra.mxu0 %v4764_v59 }
 0x307   :  { %3413 = vmatmul.mubr.bf16.vlgmr.msra.gmra.mrb[32].mxu0 %v5295_v58  ;;  %v4781_v58 = vld [vmem:[%s5396_s7 + $0x78] sm:$0xff]  }
 0x308   :  { %3422 = vmatprep.mubr.bf16.mxu0 %v5309_v42  ;;  %4091 = vmatprep.subr.bf16.mxu1 %v4781_v58  ;;  %v2975_v42 = vld [vmem:[%s5395_s6] sm:$0x3] }
 0x309   :  { %v2980_v48 = vrot.slane %v2975_v42, %v5032_v18  ;;  %v2984_v47 = vrot.slane %v2975_v42, %v5040_v20 }
 0x30f   :  { %3423 = vmatmul.mubr.bf16.gmra.mrb[36].mxu0 %v5307_v32  ;;  %v4782_v32 = vld [vmem:[%s5396_s7 + $0x38] sm:$0xff]  }
 0x310   :  { %3432 = vmatprep.mubr.bf16.mxu0 %v5321_v40  ;;  %4092 = vmatpush3.bf16.msra.mxu1 %v4782_v32 }
 0x317   :  { %3433 = vmatmul.mubr.bf16.gmra.mrb[40].mxu0 %v5319_v27 }
 0x318   :  { %3442 = vmatprep.mubr.bf16.mxu0 %v2910_v35 }
 0x31f   :  { %3443 = vmatmul.mubr.bf16.gmra.mrb[44].mxu0 %v2909_v51 }
 0x3da   :  { %v3414_v62 = vpop.f32.mrb[32].mxu0 }
 0x3db   :  { %v4149_v27 = vadd.f32 %v3414_v62, %v2980_v48  ;;  %v3416_v21 = vpop.f32.mrb[33].mxu0 }
 0x3dc   :  { %v4150_v40 = vadd.f32 %v3416_v21, %v2984_v47  ;;  %v3418_v41 = vpop.f32.mrb[34].mxu0 }
 0x3dd   :  { %v4151_v2 = vadd.f32 %v3418_v41, %v2980_v48  ;;  %v3420_v3 = vpop.f32.mrb[35].mxu0  ;;  %v3453_v30 = vmax.f32 %v4149_v27, 0.0 }
 0x3de   :  { %v4152_v4 = vadd.f32 %v3420_v3, %v2984_v47  ;;  %v3454_v15 = vmax.f32 %v4150_v40, 0.0 }
 0x3df   :  { %v3455_v5 = vmax.f32 %v4151_v2, 0.0 }
 0x3e0   :  { %v3456_v9 = vmax.f32 %v4152_v4, 0.0 }
 0x3e1   :  { %v3469_v44 = vpack.c.bf16 %v3455_v5, %v3453_v30 }
 0x3e2   :  { %v3470_v10 = vpack.c.bf16 %v3456_v9, %v3454_v15  ;;  %v3424_v12 = vpop.f32.mrb[36].mxu0 }
 0x3e3   :  { %v4153_v13 = vadd.f32 %v3424_v12, %v2980_v48  ;;  %v3426_v14 = vpop.f32.mrb[37].mxu0 }
 0x3e4   :  { %v4154_v18 = vadd.f32 %v3426_v14, %v2984_v47  ;;  %v3428_v16 = vpop.f32.mrb[38].mxu0  ;;  %3644 = vmatprep.mubr.bf16.mxu1 %v3470_v10 }
 0x3e5   :  { %v4155_v20 = vadd.f32 %v3428_v16, %v2980_v48  ;;  %v3430_v11 = vpop.f32.mrb[39].mxu0  ;;  %3645 = vmatmul.mubr.bf16.vlgmr.msra.gmra.mrb[64].mxu1 %v3469_v44  ;;  %v3457_v25 = vmax.f32 %v4153_v13, 0.0 }
 0x3e6   :  { %v4156_v23 = vadd.f32 %v3430_v11, %v2984_v47  ;;  %v3458_v26 = vmax.f32 %v4154_v18, 0.0 }
 0x3e7   :  { %v3459_v7 = vmax.f32 %v4155_v20, 0.0 }
 0x3e8   :  { %v3460_v29 = vmax.f32 %v4156_v23, 0.0 }
 0x3e9   :  { %v3471_v31 = vpack.c.bf16 %v3459_v7, %v3457_v25 }
 0x3ea   :  { %v3472_v38 = vpack.c.bf16 %v3460_v29, %v3458_v26  ;;  %v3434_v22 = vpop.f32.mrb[40].mxu0 }
 0x3eb   :  { %v4157_v63 = vadd.f32 %v3434_v22, %v2980_v48  ;;  %v3436_v1 = vpop.f32.mrb[41].mxu0 }
 0x3ec   :  { %v4158_v45 = vadd.f32 %v3436_v1, %v2984_v47  ;;  %v3438_v33 = vpop.f32.mrb[42].mxu0  ;;  %3652 = vmatprep.mubr.bf16.mxu1 %v3472_v38 }
 0x3ed   :  { %v4159_v53 = vadd.f32 %v3438_v33, %v2980_v48  ;;  %v3440_v34 = vpop.f32.mrb[43].mxu0  ;;  %3653 = vmatmul.mubr.bf16.gmra.mrb[68].mxu1 %v3471_v31  ;;  %v3461_v49 = vmax.f32 %v4157_v63, 0.0 }
 0x3ee   :  { %v4160_v51 = vadd.f32 %v3440_v34, %v2984_v47  ;;  %v3462_v36 = vmax.f32 %v4158_v45, 0.0 }
 0x3ef   :  { %v3463_v35 = vmax.f32 %v4159_v53, 0.0 }
 0x3f0   :  { %v3464_v37 = vmax.f32 %v4160_v51, 0.0 }
 0x3f1   :  { %v3473_v55 = vpack.c.bf16 %v3463_v35, %v3461_v49 }
 0x3f2   :  { %v3474_v17 = vpack.c.bf16 %v3464_v37, %v3462_v36  ;;  %v3444_v54 = vpop.f32.mrb[44].mxu0 }
 0x3f3   :  { %v4161_v24 = vadd.f32 %v3444_v54, %v2980_v48  ;;  %v3446_v56 = vpop.f32.mrb[45].mxu0 }
 0x3f4   :  { %v4162_v57 = vadd.f32 %v3446_v56, %v2984_v47  ;;  %v3448_v19 = vpop.f32.mrb[46].mxu0  ;;  %3660 = vmatprep.mubr.bf16.mxu1 %v3474_v17 }
 0x3f5   :  { %v4163_v0 = vadd.f32 %v3448_v19, %v2980_v48  ;;  %v3450_v28 = vpop.f32.mrb[47].mxu0  ;;  %3661 = vmatmul.mubr.bf16.gmra.mrb[72].mxu1 %v3473_v55  ;;  %v3465_v60 = vmax.f32 %v4161_v24, 0.0 }
 0x3f6   :  { %v4164_v8 = vadd.f32 %v3450_v28, %v2984_v47  ;;  %v3466_v46 = vmax.f32 %v4162_v57, 0.0 }
 0x3f7   :  { %v3467_v50 = vmax.f32 %v4163_v0, 0.0 }
 0x3f8   :  { %v3468_v52 = vmax.f32 %v4164_v8, 0.0 }
 0x3f9   :  { %v3475_v43 = vpack.c.bf16 %v3467_v50, %v3465_v60 }
 0x3fa   :  { %v3476_v39 = vpack.c.bf16 %v3468_v52, %v3466_v46 }
 0x3fc   :  { %3668 = vmatprep.mubr.bf16.mxu1 %v3476_v39 }
 0x3fd   :  { %3669 = vmatmul.mubr.bf16.gmra.mrb[76].mxu1 %v3475_v43 }
 0x4b8   :  { %v4093_v59 = vpop.f32.mrb[64].mxu1 }
 0x4b9   :  { %v4094_v61 = vpop.f32.mrb[65].mxu1 }
 0x4ba   :  { %v4095_v58 = vadd.f32 %v4094_v61, %v4093_v59  ;;  %v4096_v32 = vpop.f32.mrb[66].mxu1 }
 0x4bb   :  { %v4097_v42 = vpop.f32.mrb[67].mxu1 }
 0x4bc   :  { %v3647_v48 = vadd.f32 %v4095_v58, %v4060_v6  ;;  %v4098_v47 = vadd.f32 %v4097_v42, %v4096_v32 }
 0x4be   :  { %3678 = vst.msk [vmem:[%s5398_s9] sm:$0xff] %vm3677_vm1, %v3647_v48  ;;  %v3650_v62 = vadd.f32 %v4098_v47, %v4060_v6 }
 0x4c0   :  { %3679 = vst.msk [vmem:[%s5398_s9 + $0x8] sm:$0xff] %vm3677_vm1, %v3650_v62  ;;  %v4099_v27 = vpop.f32.mrb[68].mxu1 }
 0x4c1   :  { %v4100_v21 = vpop.f32.mrb[69].mxu1 }
 0x4c2   :  { %v4101_v40 = vadd.f32 %v4100_v21, %v4099_v27  ;;  %v4102_v41 = vpop.f32.mrb[70].mxu1 }
 0x4c3   :  { %v4103_v2 = vpop.f32.mrb[71].mxu1 }
 0x4c4   :  { %v3655_v3 = vadd.f32 %v4101_v40, %v4060_v6  ;;  %v4104_v4 = vadd.f32 %v4103_v2, %v4102_v41 }
 0x4c6   :  { %3680 = vst.msk [vmem:[%s5398_s9 + $0x10] sm:$0xff] %vm3677_vm1, %v3655_v3  ;;  %v3658_v30 = vadd.f32 %v4104_v4, %v4060_v6 }
 0x4c8   :  { %3681 = vst.msk [vmem:[%s5398_s9 + $0x18] sm:$0xff] %vm3677_vm1, %v3658_v30  ;;  %v4105_v5 = vpop.f32.mrb[72].mxu1 }
 0x4c9   :  { %v4106_v15 = vpop.f32.mrb[73].mxu1 }
 0x4ca   :  { %v4107_v9 = vadd.f32 %v4106_v15, %v4105_v5  ;;  %v4108_v44 = vpop.f32.mrb[74].mxu1 }
 0x4cb   :  { %v4109_v10 = vpop.f32.mrb[75].mxu1 }
 0x4cc   :  { %v3663_v12 = vadd.f32 %v4107_v9, %v4060_v6  ;;  %v4110_v13 = vadd.f32 %v4109_v10, %v4108_v44 }
 0x4ce   :  { %3682 = vst.msk [vmem:[%s5398_s9 + $0x20] sm:$0xff] %vm3677_vm1, %v3663_v12  ;;  %v3666_v14 = vadd.f32 %v4110_v13, %v4060_v6 }
 0x4d0   :  { %3683 = vst.msk [vmem:[%s5398_s9 + $0x28] sm:$0xff] %vm3677_vm1, %v3666_v14  ;;  %v4111_v18 = vpop.f32.mrb[76].mxu1 }
 0x4d1   :  { %v4112_v16 = vpop.f32.mrb[77].mxu1 }
 0x4d2   :  { %v4113_v20 = vadd.f32 %v4112_v16, %v4111_v18  ;;  %v4114_v11 = vpop.f32.mrb[78].mxu1 }
 0x4d3   :  { %v4115_v23 = vpop.f32.mrb[79].mxu1 }
 0x4d4   :  { %v3671_v25 = vadd.f32 %v4113_v20, %v4060_v6  ;;  %v4116_v7 = vadd.f32 %v4115_v23, %v4114_v11 }
 0x4d6   :  { %3684 = vst.msk [vmem:[%s5398_s9 + $0x30] sm:$0xff] %vm3677_vm1, %v3671_v25  ;;  %v3674_v26 = vadd.f32 %v4116_v7, %v4060_v6 }
 0x4d8   :  { %3685 = vst.msk [vmem:[%s5398_s9 + $0x38] sm:$0xff] %vm3677_vm1, %v3674_v26 }
 0x4d9   :  { %3690 = vsyncpa [#allocation3], 1 }
 0x4da   :  { %3691 = vsyncpa [#allocation5], 1 }

</bundles_post_ra>
